<compile_context>
chip_gen: v6e
topology: v6e:2x2x1
jax: 0.10.0
libtpu: 0.0.40
codegen_flags: <defaults>
</compile_context>

<pallas_src>
import jax
import jax.numpy as jnp
from jax import lax
from jax.experimental import pallas as pl
from jax.experimental.pallas import tpu as pltpu


def _round_up(x, m):
    return ((x + m - 1) // m) * m


def _make_kernel(KH, KW, OH, OW, stride, dilation, relu):
    def kernel(x_ref, w_ref, b_ref, o_ref):
        # x_ref: (1, Hp, Wp, Cin)       padded NHWC input, one batch element
        # w_ref: (KH*KW*Cin, Cpad)      BN-scale-folded weights, Cout zero-padded to lane width
        # b_ref: (1, Cpad)              folded BN bias (f32, zero-padded)
        # o_ref: (1, OH*OW, Cpad)       lane-dense, flattened-spatial output
        taps = []
        for kh in range(KH):
            for kw in range(KW):
                r0 = kh * dilation
                c0 = kw * dilation
                if stride == 1:
                    t = x_ref[0, pl.ds(r0, OH), pl.ds(c0, OW), :]
                else:
                    # TODO(synk): for stride>1 layers hoist the strided W (sublane)
                    # gather out of the kernel (pre-select columns / index_map).
                    t = x_ref[0,
                              pl.ds(r0, OH, stride=stride),
                              pl.ds(c0, OW, stride=stride), :]
                taps.append(t)

        # Fuse all KH*KW taps into a single MXU matmul with K = KH*KW*Cin.
        patch = jnp.concatenate(taps, axis=-1)              # (OH, OW, KH*KW*Cin)
        patch = patch.reshape(OH * OW, patch.shape[-1])     # one reshape per tile

        # Native-dtype operands, f32 accumulate on the MXU.
        y = jnp.dot(patch, w_ref[...], preferred_element_type=jnp.float32)

        # Epilogue: bias (BN scale already folded into w) + ReLU, stored lane-dense.
        y = y + b_ref[...]
        if relu:
            y = jnp.maximum(y, 0.0)
        o_ref[0] = y.astype(o_ref.dtype)

    return kernel


def basic_conv(x_nchw, weight_oihw, bn_scale, bn_bias, *,
               stride=1, padding=0, dilation=1, relu=True):
    """BasicConv forward. x_nchw: (N, Cin, H, W); weight_oihw: (Cout, Cin, KH, KW)."""
    N, Cin, H, W = x_nchw.shape
    Cout, Cin_w, KH, KW = weight_oihw.shape
    assert Cin_w == Cin, "groups != 1 not supported in this kernel"
    OH = (H + 2 * padding - dilation * (KH - 1) - 1) // stride + 1
    OW = (W + 2 * padding - dilation * (KW - 1) - 1) // stride + 1
    Cpad = _round_up(Cout, 128)          # lane-dense output channel dimension

    # --- glue: layout + padding + weight prep (plain JAX, runs once per call) ---
    x = jnp.transpose(x_nchw, (0, 2, 3, 1))                        # NCHW -> NHWC
    x = jnp.pad(x, ((0, 0), (padding, padding), (padding, padding), (0, 0)))
    Hp, Wp = x.shape[1], x.shape[2]

    # (Cout, Cin, KH, KW) -> (KH, KW, Cin, Cout), fold BN scale, flatten taps, pad lanes.
    w = jnp.transpose(weight_oihw, (2, 3, 1, 0))
    w = w * bn_scale[None, None, None, :]
    w = w.reshape(KH * KW * Cin, Cout).astype(x.dtype)
    w = jnp.pad(w, ((0, 0), (0, Cpad - Cout)))
    b = jnp.pad(bn_bias.astype(jnp.float32), ((0, Cpad - Cout),)).reshape(1, Cpad)

    kernel = _make_kernel(KH, KW, OH, OW, stride, dilation, relu)

    # Advisory cost hint for the XLA scheduler around the custom call.
    flops = 2 * N * OH * OW * (KH * KW * Cin) * Cpad
    bytes_accessed = (x.size * x.dtype.itemsize
                      + w.size * w.dtype.itemsize
                      + b.size * b.dtype.itemsize
                      + N * OH * OW * Cpad * x.dtype.itemsize)
    cost = pl.CostEstimate(flops=flops, transcendentals=0,
                           bytes_accessed=bytes_accessed)

    out = pl.pallas_call(
        kernel,
        out_shape=jax.ShapeDtypeStruct((N, OH * OW, Cpad), x.dtype),
        grid=(N,),
        in_specs=[
            pl.BlockSpec((1, Hp, Wp, Cin), lambda n: (n, 0, 0, 0)),
            # Constant block index -> weights/bias stay resident in VMEM across grid.
            pl.BlockSpec((KH * KW * Cin, Cpad), lambda n: (0, 0)),
            pl.BlockSpec((1, Cpad), lambda n: (0, 0)),
        ],
        out_specs=pl.BlockSpec((1, OH * OW, Cpad), lambda n: (n, 0, 0)),
        compiler_params=pltpu.CompilerParams(
            dimension_semantics=("parallel",)),   # batch elements are independent
        cost_estimate=cost,
    )(x, w, b)

    # Strip channel padding, restore NCHW.
    out = out[:, :, :Cout].reshape(N, OH, OW, Cout)
    return jnp.transpose(out, (0, 3, 1, 2))


def _reference(x_nchw, weight_oihw, bn_scale, bn_bias, *,
               stride=1, padding=0, dilation=1, relu=True):
    y = lax.conv_general_dilated(
        x_nchw.astype(jnp.float32), weight_oihw.astype(jnp.float32),
        window_strides=(stride, stride),
        padding=[(padding, padding), (padding, padding)],
        rhs_dilation=(dilation, dilation),
        dimension_numbers=("NCHW", "OIHW", "NCHW"))
    y = y * bn_scale[None, :, None, None] + bn_bias[None, :, None, None]
    if relu:
        y = jnp.maximum(y, 0.0)
    return y


if __name__ == "__main__":
    # BasicConv(in_planes=4, out_planes=8, kernel_size=3, stride=1, padding=1)
    N, Cin, H, W = 2, 4, 16, 16
    Cout, K = 8, 3
    stride, padding, dilation = 1, 1, 1

    key = jax.random.PRNGKey(0)
    kx, kw, kg, kb, km, kv = jax.random.split(key, 6)

    x = jax.random.normal(kx, (N, Cin, H, W), dtype=jnp.float32)
    weight = jax.random.normal(kw, (Cout, Cin, K, K), dtype=jnp.float32) * 0.1

    # BatchNorm2d(out_planes, eps=1e-5, affine=True) parameters + running stats.
    eps = 1e-5
    gamma = 1.0 + 0.1 * jax.random.normal(kg, (Cout,), dtype=jnp.float32)
    beta = 0.1 * jax.random.normal(kb, (Cout,), dtype=jnp.float32)
    running_mean = 0.1 * jax.random.normal(km, (Cout,), dtype=jnp.float32)
    running_var = jnp.abs(jax.random.normal(kv, (Cout,), dtype=jnp.float32)) + 0.5

    bn_scale = gamma / jnp.sqrt(running_var + eps)
    bn_bias = beta - running_mean * bn_scale

    out = basic_conv(x, weight, bn_scale, bn_bias,
                     stride=stride, padding=padding, dilation=dilation, relu=True)
    out = jax.block_until_ready(out)

    ref = _reference(x, weight, bn_scale, bn_bias,
                     stride=stride, padding=padding, dilation=dilation, relu=True)
    assert out.shape == (N, Cout, H, W)
    assert jnp.allclose(out, ref, atol=1e-4, rtol=1e-4), "mismatch vs reference"

    print("KERNEL_OK")
</pallas_src>

<mosaic_0001>
module attributes {stable_mosaic.version = 11 : i64} {
  func.func @kernel(%arg0: i32, %arg1: memref<1x18x18x4xf32, #tpu.memory_space<vmem>>, %arg2: memref<36x128xf32, #tpu.memory_space<vmem>>, %arg3: memref<1x128xf32, #tpu.memory_space<vmem>>, %arg4: memref<1x256x128xf32, #tpu.memory_space<vmem>>) attributes {dimension_semantics = [#tpu.dimension_semantics<parallel>], iteration_bounds = array<i64: 2>, scalar_prefetch = 0 : i64, scratch_operands = 0 : i64, tpu.core_type = #tpu.core_type<tc>, window_params = [{transform_indices = @transform_0, window_bounds = array<i64: 1, 18, 18, 4>}, {pipeline_mode = #tpu.pipeline_mode<synchronous>, transform_indices = @transform_1, window_bounds = array<i64: 36, 128>}, {pipeline_mode = #tpu.pipeline_mode<synchronous>, transform_indices = @transform_2, window_bounds = array<i64: 1, 128>}, {transform_indices = @transform_3, window_bounds = array<i64: 1, 256, 128>}]} {
    %c0 = arith.constant 0 : index
    %c0_0 = arith.constant 0 : index
    %c0_1 = arith.constant 0 : index
    %c0_2 = arith.constant 0 : index
    %0 = vector.load %arg1[%c0, %c0_0, %c0_1, %c0_2] : memref<1x18x18x4xf32, #tpu.memory_space<vmem>>, vector<1x16x16x4xf32>
    %1 = vector.shape_cast %0 : vector<1x16x16x4xf32> to vector<16x16x4xf32>
    %c0_3 = arith.constant 0 : index
    %c0_4 = arith.constant 0 : index
    %c1 = arith.constant 1 : index
    %c0_5 = arith.constant 0 : index
    %2 = vector.load %arg1[%c0_3, %c0_4, %c1, %c0_5] : memref<1x18x18x4xf32, #tpu.memory_space<vmem>>, vector<1x16x16x4xf32>
    %3 = vector.shape_cast %2 : vector<1x16x16x4xf32> to vector<16x16x4xf32>
    %c0_6 = arith.constant 0 : index
    %c0_7 = arith.constant 0 : index
    %c2 = arith.constant 2 : index
    %c0_8 = arith.constant 0 : index
    %4 = vector.load %arg1[%c0_6, %c0_7, %c2, %c0_8] : memref<1x18x18x4xf32, #tpu.memory_space<vmem>>, vector<1x16x16x4xf32>
    %5 = vector.shape_cast %4 : vector<1x16x16x4xf32> to vector<16x16x4xf32>
    %c0_9 = arith.constant 0 : index
    %c1_10 = arith.constant 1 : index
    %c0_11 = arith.constant 0 : index
    %c0_12 = arith.constant 0 : index
    %6 = vector.load %arg1[%c0_9, %c1_10, %c0_11, %c0_12] : memref<1x18x18x4xf32, #tpu.memory_space<vmem>>, vector<1x16x16x4xf32>
    %7 = vector.shape_cast %6 : vector<1x16x16x4xf32> to vector<16x16x4xf32>
    %c0_13 = arith.constant 0 : index
    %c1_14 = arith.constant 1 : index
    %c1_15 = arith.constant 1 : index
    %c0_16 = arith.constant 0 : index
    %8 = vector.load %arg1[%c0_13, %c1_14, %c1_15, %c0_16] : memref<1x18x18x4xf32, #tpu.memory_space<vmem>>, vector<1x16x16x4xf32>
    %9 = vector.shape_cast %8 : vector<1x16x16x4xf32> to vector<16x16x4xf32>
    %c0_17 = arith.constant 0 : index
    %c1_18 = arith.constant 1 : index
    %c2_19 = arith.constant 2 : index
    %c0_20 = arith.constant 0 : index
    %10 = vector.load %arg1[%c0_17, %c1_18, %c2_19, %c0_20] : memref<1x18x18x4xf32, #tpu.memory_space<vmem>>, vector<1x16x16x4xf32>
    %11 = vector.shape_cast %10 : vector<1x16x16x4xf32> to vector<16x16x4xf32>
    %c0_21 = arith.constant 0 : index
    %c2_22 = arith.constant 2 : index
    %c0_23 = arith.constant 0 : index
    %c0_24 = arith.constant 0 : index
    %12 = vector.load %arg1[%c0_21, %c2_22, %c0_23, %c0_24] : memref<1x18x18x4xf32, #tpu.memory_space<vmem>>, vector<1x16x16x4xf32>
    %13 = vector.shape_cast %12 : vector<1x16x16x4xf32> to vector<16x16x4xf32>
    %c0_25 = arith.constant 0 : index
    %c2_26 = arith.constant 2 : index
    %c1_27 = arith.constant 1 : index
    %c0_28 = arith.constant 0 : index
    %14 = vector.load %arg1[%c0_25, %c2_26, %c1_27, %c0_28] : memref<1x18x18x4xf32, #tpu.memory_space<vmem>>, vector<1x16x16x4xf32>
    %15 = vector.shape_cast %14 : vector<1x16x16x4xf32> to vector<16x16x4xf32>
    %c0_29 = arith.constant 0 : index
    %c2_30 = arith.constant 2 : index
    %c2_31 = arith.constant 2 : index
    %c0_32 = arith.constant 0 : index
    %16 = vector.load %arg1[%c0_29, %c2_30, %c2_31, %c0_32] : memref<1x18x18x4xf32, #tpu.memory_space<vmem>>, vector<1x16x16x4xf32>
    %17 = vector.shape_cast %16 : vector<1x16x16x4xf32> to vector<16x16x4xf32>
    %18 = tpu.concatenate %1, %3, %5, %7, %9, %11, %13, %15, %17 in 2 : vector<16x16x4xf32>, vector<16x16x4xf32>, vector<16x16x4xf32>, vector<16x16x4xf32>, vector<16x16x4xf32>, vector<16x16x4xf32>, vector<16x16x4xf32>, vector<16x16x4xf32>, vector<16x16x4xf32> -> vector<16x16x36xf32>
    %19 = vector.shape_cast %18 : vector<16x16x36xf32> to vector<256x36xf32>
    %c0_33 = arith.constant 0 : index
    %c0_34 = arith.constant 0 : index
    %20 = vector.load %arg2[%c0_33, %c0_34] : memref<36x128xf32, #tpu.memory_space<vmem>>, vector<36x128xf32>
    %cst = arith.constant dense<0.000000e+00> : vector<256x128xf32>
    %21 = tpu.matmul %19, %20, %cst {dimension_numbers = #tpu.dot_dimension_numbers<[1], [0], [0], [1], [0, 0, 1, 1], [], []>} : vector<256x36xf32>, vector<36x128xf32>, vector<256x128xf32> -> vector<256x128xf32>
    %c0_35 = arith.constant 0 : index
    %c0_36 = arith.constant 0 : index
    %22 = vector.load %arg3[%c0_35, %c0_36] : memref<1x128xf32, #tpu.memory_space<vmem>>, vector<1x128xf32>
    %23 = vector.broadcast %22 : vector<1x128xf32> to vector<256x128xf32>
    %24 = arith.addf %21, %23 : vector<256x128xf32>
    %cst_37 = arith.constant 0.000000e+00 : f32
    %25 = vector.broadcast %cst_37 : f32 to vector<256x128xf32>
    %26 = arith.maximumf %24, %25 : vector<256x128xf32>
    %c0_38 = arith.constant 0 : index
    %c0_39 = arith.constant 0 : index
    %c0_40 = arith.constant 0 : index
    %27 = vector.load %arg4[%c0_38, %c0_39, %c0_40] : memref<1x256x128xf32, #tpu.memory_space<vmem>>, vector<1x256x128xf32>
    %28 = vector.shape_cast %27 : vector<1x256x128xf32> to vector<256x128xf32>
    %29 = vector.shape_cast %26 : vector<256x128xf32> to vector<1x256x128xf32>
    tpu.vector_store %arg4[%c0_38, %c0_39, %c0_40], %29 {strides = array<i32>} : memref<1x256x128xf32, #tpu.memory_space<vmem>>, vector<1x256x128xf32>,
    return
  }
  func.func @transform_0(%arg0: i32) -> (i32, i32, i32, i32) {
    %c0_i32 = arith.constant 0 : i32
    %c0_i32_0 = arith.constant 0 : i32
    %c0_i32_1 = arith.constant 0 : i32
    %c0_i32_2 = arith.constant 0 : i32
    return %arg0, %c0_i32, %c0_i32_0, %c0_i32_1 : i32, i32, i32, i32
  }
  func.func @transform_1(%arg0: i32) -> (i32, i32) {
    %c0_i32 = arith.constant 0 : i32
    %c0_i32_0 = arith.constant 0 : i32
    %c0_i32_1 = arith.constant 0 : i32
    return %c0_i32, %c0_i32_0 : i32, i32
  }
  func.func @transform_2(%arg0: i32) -> (i32, i32) {
    %c0_i32 = arith.constant 0 : i32
    %c0_i32_0 = arith.constant 0 : i32
    %c0_i32_1 = arith.constant 0 : i32
    return %c0_i32, %c0_i32_0 : i32, i32
  }
  func.func @transform_3(%arg0: i32) -> (i32, i32, i32) {
    %c0_i32 = arith.constant 0 : i32
    %c0_i32_0 = arith.constant 0 : i32
    %c0_i32_1 = arith.constant 0 : i32
    return %arg0, %c0_i32, %c0_i32_0 : i32, i32, i32
  }
}

</mosaic_0001>

<bundles_post_ra>
// kernel: tpu_custom_call.1
= control target key start
LH: loop header
LB: loop body
LE: loop exit
PB: predicated region body
PF: predicated region fallthrough
CT: control target
= control target key end

     0   :  { %8 = vsyncpa [#allocation3], 0  ;;  %s4273_s0 = inlined_call_operand.vmem [shape: f32[2,18,18,4], index: 0, kind: input, shape index: {}]   ;;  %s4274_s1 = inlined_call_operand.vmem [shape: f32[36,128], index: 1, kind: input, shape index: {}]   ;;  %s4275_s2 = inlined_call_operand.vmem [shape: f32[1,128], index: 2, kind: input, shape index: {}]   ;;  %s4276_s3 = inlined_call_operand.hbm [shape: f32[2,256,128], index: 3, kind: output, shape index: {}]  }
   0x1   :  { %10 = vsyncpa [#allocation3 + $0x1], 0  ;;  %s2709_s12 = smov 0   ;;  %s2711_s13 = smov 0  }
   0x2   :  { %s2713_s14 = smov 0   ;;  %s2715_s15 = smov 0  }
   0x3 LB: > { %s2730_s16 = sadd.s32 4294967295, %s2677_s15   ;;  %s2225_s17 = sadd.s32 4294967294, %s2677_s15   ;;  %s2677_s15 = sphi %s2715_s15, %s4435_s15   ;;  %s2673_s14 = sphi %s2713_s14, %s4434_s14   ;;  %s2669_s13 = sphi %s2711_s13, %s4433_s13   ;;  %s2665_s12 = sphi %s2709_s12, %s4432_s12  }
   0x4   : > { %s2734_s18 = sadd.s32 1, %s2677_s15   ;;  %s91_s19 = sadd.s32 1, %s2673_s14 }
   0x5   : > { %s88_s20 = ssub.s32 %s2677_s15, %s2734_s18  ;;  %p101_p0 = scmp.ne.s32.totalorder %s2673_s14, %s2669_s13 }
   0x6   : > { %p89_p1 = scmp.eq.s32.totalorder %s88_s20, 0  ;;  %p102_p2 = scmp.eq.s32.totalorder %s2730_s16, 1 }
   0x7   : > { %p107_p3 = scmp.ne.s32.totalorder %s2669_s13, %s2665_s12  ;;  %p108_p4 = scmp.eq.s32.totalorder %s2225_s17, 1 }
   0x8   : > { %s2745_s21 = scalar_select %p89_p1, %s2673_s14, %s91_s19  }
   0x9   : > { %p2747_p5 = por %p102_p2, %p101_p0  ;;  %p2751_p6 = por %p108_p4, %p107_p3 }
   0xa   : > { %p2228_p7 = scmp.ge.s32.totalorder %s2677_s15, 1  ;;  %p140_p8 = scmp.lt.s32.totalorder %s2677_s15, 3 }
   0xc   : > { %p141_p9 = pnand %p2228_p7, %p140_p8 }
   0xe   : > { %144 = sbr.rel (%p141_p9) target bundleno = 864 (0x360), region = 32 }
  0x13   : > { %p164_p10 = scmp.lt.s32.totalorder %s2730_s16, 1  ;;  %s2679_s29 = smov 4   ;;  %vm1483_vm0 = vcmask 31744   ;;  %vm1516_vm1 = vcmask 64512   ;;  %vm1856_vm2 = vcmask 1043456   ;;  %vm1549_vm3 = vcmask 97280  }
  0x14   : > { %s2680_s30 = smov 8   ;;  %s2681_s4 = smov 12   ;;  %vm1582_vm4 = vcmask 130048   ;;  %vm1615_vm5 = vcmask 162816   ;;  %vm1648_vm6 = vcmask 195584   ;;  %vm1681_vm7 = vcmask 228352  }
  0x15   : > { %s165_s24 = scalar_select %p164_p10, %s2730_s16, 1  ;;  %vm1714_vm8 = vcmask 261120   ;;  %vm1759_vm9 = vcmask 293888  }
  0x16   : > { %s2682_s5 = smov 16   ;;  %s2683_s6 = smov 20  }
  0x17   : > { %s2568_s25 = smul.u32 432, %s165_s24  ;;  %s2684_s7 = smov 24  }
  0x18   : > { %s2685_s17 = smov 28   ;;  %s2462_s8 = sshll.u32 %s2730_s16, 12 }
  0x19   : > { %s2762_s28 = scalar_lea.vmem %s4273_s0, %s2568_s25  ;;  %s2687_s20 = smov [#allocation2]  }
  0x1a   : > { %v2765_v0 = vld [vmem:[%s2762_s28 + $0x19] sm:$0xff]  ;;  %v201_v1 = vld [vmem:[%s2762_s28 + $0x1] sm:$0xff]  ;;  %v202_v3 = vld [vmem:[%s2762_s28 + $0x9] sm:$0xff]  ;;  %s2621_s24 = sshll.u32 %s2687_s20, 4  ;;  %s2622_s24 = int_to_ptr.vmem [resolvable:$false] %s2621_s24 }
  0x1b   : > { %495 = vrot.lane.b32.xlu1 %v2765_v0, %s2679_s29  ;;  %491 = vrot.lane.b32.xlu0 %v201_v1, %s2679_s29  ;;  %v2772_v2 = vld [vmem:[%s2762_s28 + $0x21] sm:$0xff]  ;;  %v2779_v4 = vld [vmem:[%s2762_s28 + $0x39] sm:$0xff]  ;;  %s2623_s25 = scalar_lea.vmem %s2622_s24, 8192 }
  0x1c   : > { %v2782_v5 = vld [vmem:[%s2762_s28 + $0x31] sm:$0xff]  ;;  %v2792_v7 = vld [vmem:[%s2762_s28 + $0x49] sm:$0xff]  ;;  %v2802_v9 = vld [vmem:[%s2762_s28 + $0x61] sm:$0xff] }
  0x1d   : > { %v2789_v6 = vld [vmem:[%s2762_s28 + $0x51] sm:$0xff]  ;;  %v2799_v8 = vld [vmem:[%s2762_s28 + $0x69] sm:$0xff]  ;;  %v2809_v10 = vld [vmem:[%s2762_s28 + $0x81] sm:$0xff] }
  0x1e   : > { %v2812_v11 = vld [vmem:[%s2762_s28 + $0x79] sm:$0xff]  ;;  %v2822_v13 = vld [vmem:[%s2762_s28 + $0x91] sm:$0xff]  ;;  %v2832_v15 = vld [vmem:[%s2762_s28 + $0xa9] sm:$0xff] }
  0x1f   : > { %497 = vrot.lane.b32.xlu1 %v2772_v2, %s2679_s29  ;;  %493 = vrot.lane.b32.xlu0 %v202_v3, %s2679_s29  ;;  %v2819_v12 = vld [vmem:[%s2762_s28 + $0x99] sm:$0xff]  ;;  %v2829_v14 = vld [vmem:[%s2762_s28 + $0xb1] sm:$0xff] }
  0x20   : > { %v218_v16 = vld [vmem:[%s2762_s28 + $0xc9] sm:$0xff]  ;;  %v217_v17 = vld [vmem:[%s2762_s28 + $0xc1] sm:$0xff]  ;;  %v2846_v19 = vld [vmem:[%s2762_s28 + $0xd9] sm:$0xff] }
  0x21   : > { %v2843_v18 = vld [vmem:[%s2762_s28 + $0xe1] sm:$0xff]  ;;  %v2853_v20 = vld [vmem:[%s2762_s28 + $0xf9] sm:$0xff]  ;;  %v2856_v21 = vld [vmem:[%s2762_s28 + $0xf1] sm:$0xff] }
  0x22   : > { %4320 = vst [vmem:[#allocation5_spill] sm:$0xff] %v2853_v20  ;;  %4321 = vst [vmem:[#allocation6_spill] sm:$0xff] %v2856_v21  ;;  %v2863_v22 = vld [vmem:[%s2762_s28 + $0x111] sm:$0xff]  ;;  %v2866_v23 = vld [vmem:[%s2762_s28 + $0x109] sm:$0xff] }
  0x23   : > { %501 = vrot.lane.b32.xlu1 %v2779_v4, %s2679_s29  ;;  %499 = vrot.lane.b32.xlu0 %v2782_v5, %s2679_s29  ;;  %4322 = vst [vmem:[#allocation7_spill] sm:$0xff] %v2863_v22  ;;  %4323 = vst [vmem:[#allocation8_spill] sm:$0xff] %v2866_v23  ;;  %v226_v24 = vld [vmem:[%s2762_s28 + $0x129] sm:$0xff]  ;;  %v2874_v25 = vld [vmem:[%s2762_s28 + $0x121] sm:$0xff] }
  0x24   : > { %4324 = vst [vmem:[#allocation9_spill] sm:$0xff] %v2874_v25  ;;  %v228_v26 = vld [vmem:[%s2762_s28 + $0x141] sm:$0xff]  ;;  %v227_v27 = vld [vmem:[%s2762_s28 + $0x139] sm:$0xff]  ;;  %v229_v29 = vld [vmem:[%s2762_s28 + $0x151] sm:$0xff] }
  0x25   : > { %v230_v28 = vld [vmem:[%s2762_s28 + $0x159] sm:$0xff]  ;;  %v232_v30 = vld [vmem:[%s2762_s28 + $0x171] sm:$0xff]  ;;  %v231_v31 = vld [vmem:[%s2762_s28 + $0x169] sm:$0xff] }
  0x26   : > { %v234_v32 = vld [vmem:[%s2762_s28 + $0xa] sm:$0xff]  ;;  %v233_v33 = vld [vmem:[%s2762_s28 + $0x2] sm:$0xff]  ;;  %v2899_v35 = vld [vmem:[%s2762_s28 + $0x1a] sm:$0xff] }
  0x27   : > { %505 = vrot.lane.b32.xlu1 %v2789_v6, %s2679_s29  ;;  %503 = vrot.lane.b32.xlu0 %v2792_v7, %s2679_s29  ;;  %v2896_v34 = vld [vmem:[%s2762_s28 + $0x22] sm:$0xff]  ;;  %v2906_v36 = vld [vmem:[%s2762_s28 + $0x3a] sm:$0xff] }
  0x28   : > { %4325 = vst [vmem:[#allocation10_spill] sm:$0xff] %v2906_v36  ;;  %v2909_v37 = vld [vmem:[%s2762_s28 + $0x32] sm:$0xff]  ;;  %v2919_v39 = vld [vmem:[%s2762_s28 + $0x4a] sm:$0xff]  ;;  %v2927_v41 = vld [vmem:[%s2762_s28 + $0x62] sm:$0xff] }
  0x29   : > { %4326 = vst [vmem:[#allocation11_spill] sm:$0xff] %v2909_v37  ;;  %v2916_v38 = vld [vmem:[%s2762_s28 + $0x52] sm:$0xff]  ;;  %4328 = vst [vmem:[#allocation13_spill] sm:$0xff] %v2919_v39  ;;  %v242_v40 = vld [vmem:[%s2762_s28 + $0x6a] sm:$0xff] }
  0x2a   : > { %4327 = vst [vmem:[#allocation12_spill] sm:$0xff] %v2916_v38  ;;  %4329 = vst [vmem:[#allocation14_spill] sm:$0xff] %v2927_v41  ;;  %v244_v42 = vld [vmem:[%s2762_s28 + $0x82] sm:$0xff]  ;;  %v243_v43 = vld [vmem:[%s2762_s28 + $0x7a] sm:$0xff] }
  0x2b   : > { %509 = vrot.lane.b32.xlu1 %v2799_v8, %s2679_s29  ;;  %507 = vrot.lane.b32.xlu0 %v2802_v9, %s2679_s29  ;;  %v246_v44 = vld [vmem:[%s2762_s28 + $0x9a] sm:$0xff]  ;;  %v245_v45 = vld [vmem:[%s2762_s28 + $0x92] sm:$0xff] }
  0x2c   : > { %v248_v46 = vld [vmem:[%s2762_s28 + $0xb2] sm:$0xff]  ;;  %v247_v47 = vld [vmem:[%s2762_s28 + $0xaa] sm:$0xff]  ;;  %v249_v49 = vld [vmem:[%s2762_s28 + $0xc2] sm:$0xff] }
  0x2d   : > { %v250_v48 = vld [vmem:[%s2762_s28 + $0xca] sm:$0xff]  ;;  %v2949_v50 = vld [vmem:[%s2762_s28 + $0xe2] sm:$0xff]  ;;  %v2952_v51 = vld [vmem:[%s2762_s28 + $0xda] sm:$0xff] }
  0x2e   : > { %v2959_v52 = vld [vmem:[%s2762_s28 + $0xfa] sm:$0xff]  ;;  %v2962_v53 = vld [vmem:[%s2762_s28 + $0xf2] sm:$0xff]  ;;  %v2972_v55 = vld [vmem:[%s2762_s28 + $0x10a] sm:$0xff] }
  0x2f   : > { %513 = vrot.lane.b32.xlu1 %v2809_v10, %s2679_s29  ;;  %511 = vrot.lane.b32.xlu0 %v2812_v11, %s2679_s29  ;;  %4330 = vst [vmem:[#allocation15_spill] sm:$0xff] %v2959_v52  ;;  %4331 = vst [vmem:[#allocation16_spill] sm:$0xff] %v2962_v53  ;;  %v2969_v54 = vld [vmem:[%s2762_s28 + $0x112] sm:$0xff]  ;;  %v2979_v56 = vld [vmem:[%s2762_s28 + $0x12a] sm:$0xff] }
  0x30   : > { %4332 = vst [vmem:[#allocation17_spill] sm:$0xff] %v2969_v54  ;;  %4333 = vst [vmem:[#allocation18_spill] sm:$0xff] %v2972_v55  ;;  %v2982_v57 = vld [vmem:[%s2762_s28 + $0x122] sm:$0xff]  ;;  %v259_v59 = vld [vmem:[%s2762_s28 + $0x13a] sm:$0xff] }
  0x31   : > { %4334 = vst [vmem:[#allocation19_spill] sm:$0xff] %v2979_v56  ;;  %4335 = vst [vmem:[#allocation20_spill] sm:$0xff] %v2982_v57  ;;  %v260_v58 = vld [vmem:[%s2762_s28 + $0x142] sm:$0xff]  ;;  %v262_v62 = vld [vmem:[%s2762_s28 + $0x15a] sm:$0xff] }
  0x32   : > { %v261_v63 = vld [vmem:[%s2762_s28 + $0x152] sm:$0xff] }
  0x33   : > { %517 = vrot.lane.b32.xlu1 %v2819_v12, %s2679_s29  ;;  %515 = vrot.lane.b32.xlu0 %v2822_v13, %s2679_s29 }
  0x37   : > { %521 = vrot.lane.b32.xlu1 %v2829_v14, %s2679_s29  ;;  %519 = vrot.lane.b32.xlu0 %v2832_v15, %s2679_s29 }
  0x3b   : > { %525 = vrot.lane.b32.xlu1 %v218_v16, %s2679_s29  ;;  %523 = vrot.lane.b32.xlu0 %v217_v17, %s2679_s29  ;;  %v264_v16 = vld [vmem:[%s2762_s28 + $0x172] sm:$0xff]  ;;  %v263_v17 = vld [vmem:[%s2762_s28 + $0x16a] sm:$0xff] }
  0x3f   : > { %529 = vrot.lane.b32.xlu1 %v2843_v18, %s2679_s29  ;;  %527 = vrot.lane.b32.xlu0 %v2846_v19, %s2679_s29 }
  0x43   : > { %533 = vrot.lane.b32.xlu1 %v2853_v20, %s2679_s29  ;;  %531 = vrot.lane.b32.xlu0 %v2856_v21, %s2679_s29  ;;  %v3178_v20 = vld [vmem:[%s2762_s28 + $0x138] sm:$0xff] }
  0x47   : > { %537 = vrot.lane.b32.xlu1 %v2863_v22, %s2679_s29  ;;  %535 = vrot.lane.b32.xlu0 %v2866_v23, %s2679_s29  ;;  %v3166_v22 = vld [vmem:[%s2762_s28 + $0x120] sm:$0xff]  ;;  %v199_v23 = vld [vmem:[%s2762_s28 + $0x168] sm:$0xff] }
  0x4b   : > { %541 = vrot.lane.b32.xlu1 %v226_v24, %s2679_s29  ;;  %539 = vrot.lane.b32.xlu0 %v2874_v25, %s2679_s29  ;;  %v3152_v25 = vld [vmem:[%s2762_s28 + $0x108] sm:$0xff] }
  0x4f   : > { %545 = vrot.lane.b32.xlu1 %v228_v26, %s2679_s29  ;;  %543 = vrot.lane.b32.xlu0 %v227_v27, %s2679_s29 }
  0x53   : > { %549 = vrot.lane.b32.xlu1 %v230_v28, %s2679_s29  ;;  %547 = vrot.lane.b32.xlu0 %v229_v29, %s2679_s29  ;;  %v3017_v29 = vld [vmem:[%s2762_s28 + $0x18] sm:$0xff] }
  0x54   : > { %4340 = vst [vmem:[#allocation25_spill] sm:$0xff] %v3017_v29 }
  0x57   : > { %553 = vrot.lane.b32.xlu1 %v232_v30, %s2679_s29  ;;  %551 = vrot.lane.b32.xlu0 %v231_v31, %s2679_s29  ;;  %v3020_v30 = vld [vmem:[%s2762_s28 + $0x20] sm:$0xff]  ;;  %s2686_s29 = smov 32  }
  0x58   : > { %4341 = vst [vmem:[#allocation26_spill] sm:$0xff] %v3020_v30 }
  0x5b   : > { %621 = vrot.lane.b32.xlu1 %v234_v32, %s2680_s30  ;;  %619 = vrot.lane.b32.xlu0 %v233_v33, %s2680_s30  ;;  %v3031_v33 = vld [vmem:[%s2762_s28 + $0x38] sm:$0xff] }
  0x5f   : > { %625 = vrot.lane.b32.xlu1 %v2896_v34, %s2680_s30  ;;  %623 = vrot.lane.b32.xlu0 %v2899_v35, %s2680_s30 }
  0x63   : > { %629 = vrot.lane.b32.xlu1 %v2906_v36, %s2680_s30  ;;  %627 = vrot.lane.b32.xlu0 %v2909_v37, %s2680_s30 }
  0x67   : > { %633 = vrot.lane.b32.xlu1 %v2916_v38, %s2680_s30  ;;  %631 = vrot.lane.b32.xlu0 %v2919_v39, %s2680_s30  ;;  %v200_v39 = vld [vmem:[%s2762_s28 + $0x170] sm:$0xff] }
  0x6b   : > { %637 = vrot.lane.b32.xlu1 %v242_v40, %s2680_s30  ;;  %635 = vrot.lane.b32.xlu0 %v2927_v41, %s2680_s30  ;;  %v3034_v40 = vld [vmem:[%s2762_s28 + $0x30] sm:$0xff] }
  0x6c   : > { %v3149_v41 = vld [vmem:[%s2762_s28 + $0x110] sm:$0xff] }
  0x6f   : > { %641 = vrot.lane.b32.xlu1 %v244_v42, %s2680_s30  ;;  %639 = vrot.lane.b32.xlu0 %v243_v43, %s2680_s30 }
  0x73   : > { %645 = vrot.lane.b32.xlu1 %v246_v44, %s2680_s30  ;;  %643 = vrot.lane.b32.xlu0 %v245_v45, %s2680_s30  ;;  %v3045_v44 = vld [vmem:[%s2762_s28 + $0x50] sm:$0xff]  ;;  %v3048_v45 = vld [vmem:[%s2762_s28 + $0x48] sm:$0xff] }
  0x77   : > { %649 = vrot.lane.b32.xlu1 %v248_v46, %s2680_s30  ;;  %647 = vrot.lane.b32.xlu0 %v247_v47, %s2680_s30  ;;  %v182_v46 = vld [vmem:[%s2762_s28 + $0x98] sm:$0xff]  ;;  %v181_v47 = vld [vmem:[%s2762_s28 + $0x90] sm:$0xff] }
  0x7b   : > { %653 = vrot.lane.b32.xlu1 %v250_v48, %s2680_s30  ;;  %651 = vrot.lane.b32.xlu0 %v249_v49, %s2680_s30 }
  0x7f   : > { %657 = vrot.lane.b32.xlu1 %v2949_v50, %s2680_s30  ;;  %655 = vrot.lane.b32.xlu0 %v2952_v51, %s2680_s30 }
  0x83   : > { %661 = vrot.lane.b32.xlu1 %v2959_v52, %s2680_s30  ;;  %659 = vrot.lane.b32.xlu0 %v2962_v53, %s2680_s30  ;;  %v3175_v53 = vld [vmem:[%s2762_s28 + $0x140] sm:$0xff] }
  0x87   : > { %665 = vrot.lane.b32.xlu1 %v2969_v54, %s2680_s30  ;;  %663 = vrot.lane.b32.xlu0 %v2972_v55, %s2680_s30  ;;  %v3163_v55 = vld [vmem:[%s2762_s28 + $0x128] sm:$0xff] }
  0x8b   : > { %669 = vrot.lane.b32.xlu1 %v2979_v56, %s2680_s30  ;;  %667 = vrot.lane.b32.xlu0 %v2982_v57, %s2680_s30  ;;  %v3110_v57 = vld [vmem:[%s2762_s28 + $0xc0] sm:$0xff] }
  0x8c   : > { %4347 = vst [vmem:[#allocation32_spill] sm:$0xff] %v3110_v57 }
  0x8d   : > { %v2990_v60 = vpop.permute.xlu1 %495  ;;  %v2992_v61 = vpop.permute.xlu0 %491 }
  0x8e   : > { %4336 = vst [vmem:[#allocation21_spill] sm:$0xff] %v2990_v60  ;;  %4337 = vst [vmem:[#allocation22_spill] sm:$0xff] %v2992_v61  ;;  %v3078_v60 = vld [vmem:[%s2762_s28 + $0x78] sm:$0xff] }
  0x8f   : > { %673 = vrot.lane.b32.xlu1 %v260_v58, %s2680_s30  ;;  %671 = vrot.lane.b32.xlu0 %v259_v59, %s2680_s30  ;;  %v3057_v58 = vld [vmem:[%s2762_s28 + $0x68] sm:$0xff]  ;;  %v3060_v59 = vld [vmem:[%s2762_s28 + $0x60] sm:$0xff] }
  0x91   : > { %v2998_v1 = vpop.permute.xlu1 %497  ;;  %v3000_v3 = vpop.permute.xlu0 %493 }
  0x92   : > { %4338 = vst [vmem:[#allocation23_spill] sm:$0xff] %v2998_v1  ;;  %4339 = vst [vmem:[#allocation24_spill] sm:$0xff] %v3000_v3 }
  0x93   : > { %677 = vrot.lane.b32.xlu1 %v262_v62, %s2680_s30  ;;  %675 = vrot.lane.b32.xlu0 %v261_v63, %s2680_s30 }
  0x95   : > { %v3006_v24 = vpop.permute.xlu1 %501  ;;  %v3008_v26 = vpop.permute.xlu0 %499 }
  0x97   : > { %681 = vrot.lane.b32.xlu1 %v264_v16, %s2680_s30  ;;  %679 = vrot.lane.b32.xlu0 %v263_v17, %s2680_s30  ;;  %v184_v16 = vld [vmem:[%s2762_s28 + $0xb0] sm:$0xff]  ;;  %v183_v17 = vld [vmem:[%s2762_s28 + $0xa8] sm:$0xff] }
  0x99   : > { %v3012_v27 = vpop.permute.xlu1 %505  ;;  %v3014_v28 = vpop.permute.xlu0 %503 }
  0x9b   : > { %749 = vrot.lane.b32.xlu1 %v3020_v30, %s2681_s4  ;;  %747 = vrot.lane.b32.xlu0 %v3017_v29, %s2681_s4  ;;  %v3075_v29 = vld [vmem:[%s2762_s28 + $0x80] sm:$0xff] }
  0x9d   : > { %v3026_v31 = vpop.permute.xlu1 %509  ;;  %v3028_v32 = vpop.permute.xlu0 %507 }
  0x9f   : > { %753 = vrot.lane.b32.xlu1 %v3031_v33, %s2681_s4  ;;  %751 = vrot.lane.b32.xlu0 %v3034_v40, %s2681_s4 }
  0xa1   : > { %v3040_v42 = vpop.permute.xlu1 %513  ;;  %v3042_v43 = vpop.permute.xlu0 %511 }
  0xa3   : > { %757 = vrot.lane.b32.xlu1 %v3045_v44, %s2681_s4  ;;  %755 = vrot.lane.b32.xlu0 %v3048_v45, %s2681_s4 }
  0xa5   : > { %v518_v48 = vpop.permute.xlu1 %517  ;;  %v516_v49 = vpop.permute.xlu0 %515 }
  0xa6   : > { %v3063_v62 = vsel %vm1483_vm0, %v182_v46, %v518_v48  ;;  %v3066_v63 = vsel %vm1483_vm0, %v181_v47, %v516_v49 }
  0xa7   : > { %761 = vrot.lane.b32.xlu1 %v3057_v58, %s2681_s4  ;;  %759 = vrot.lane.b32.xlu0 %v3060_v59, %s2681_s4 }
  0xa9   : > { %v522_v30 = vpop.permute.xlu1 %521  ;;  %v520_v1 = vpop.permute.xlu0 %519 }
  0xaa   : > { %v3081_v48 = vsel %vm1483_vm0, %v184_v16, %v522_v30  ;;  %v3084_v49 = vsel %vm1483_vm0, %v183_v17, %v520_v1 }
  0xab   : > { %765 = vrot.lane.b32.xlu1 %v3075_v29, %s2681_s4  ;;  %763 = vrot.lane.b32.xlu0 %v3078_v60, %s2681_s4 }
  0xad   : > { %v3090_v3 = vpop.permute.xlu1 %525  ;;  %v3092_v61 = vpop.permute.xlu0 %523 }
  0xae   : > { %4342 = vst [vmem:[#allocation27_spill] sm:$0xff] %v3090_v3  ;;  %4343 = vst [vmem:[#allocation28_spill] sm:$0xff] %v3092_v61  ;;  %v3107_v61 = vld [vmem:[%s2762_s28 + $0xc8] sm:$0xff] }
  0xaf   : > { %769 = vrot.lane.b32.xlu1 %v182_v46, %s2681_s4  ;;  %767 = vrot.lane.b32.xlu0 %v181_v47, %s2681_s4  ;;  %4346 = vst [vmem:[#allocation31_spill] sm:$0xff] %v3107_v61 }
  0xb1   : > { %v3096_v30 = vpop.permute.xlu1 %529  ;;  %v3098_v1 = vpop.permute.xlu0 %527 }
  0xb2   : > { %4344 = vst [vmem:[#allocation29_spill] sm:$0xff] %v3096_v30  ;;  %4345 = vst [vmem:[#allocation30_spill] sm:$0xff] %v3098_v1 }
  0xb3   : > { %773 = vrot.lane.b32.xlu1 %v184_v16, %s2681_s4  ;;  %771 = vrot.lane.b32.xlu0 %v183_v17, %s2681_s4  ;;  %v3121_v16 = vld [vmem:[%s2762_s28 + $0xe0] sm:$0xff]  ;;  %v3124_v17 = vld [vmem:[%s2762_s28 + $0xd8] sm:$0xff] }
  0xb4   : > { %4348 = vst [vmem:[#allocation33_spill] sm:$0xff] %v3121_v16  ;;  %4349 = vst [vmem:[#allocation34_spill] sm:$0xff] %v3124_v17 }
  0xb5   : > { %v3102_v56 = vpop.permute.xlu1 %533  ;;  %v3104_v3 = vpop.permute.xlu0 %531 }
  0xb7   : > { %777 = vrot.lane.b32.xlu1 %v3107_v61, %s2681_s4  ;;  %775 = vrot.lane.b32.xlu0 %v3110_v57, %s2681_s4  ;;  %v3135_v61 = vld [vmem:[%s2762_s28 + $0xf8] sm:$0xff]  ;;  %v3138_v57 = vld [vmem:[%s2762_s28 + $0xf0] sm:$0xff] }
  0xb9   : > { %v3116_v46 = vpop.permute.xlu1 %537  ;;  %v3118_v47 = vpop.permute.xlu0 %535 }
  0xbb   : > { %781 = vrot.lane.b32.xlu1 %v3121_v16, %s2681_s4  ;;  %779 = vrot.lane.b32.xlu0 %v3124_v17, %s2681_s4 }
  0xbd   : > { %v3130_v30 = vpop.permute.xlu1 %541  ;;  %v3132_v1 = vpop.permute.xlu0 %539 }
  0xbf   : > { %785 = vrot.lane.b32.xlu1 %v3135_v61, %s2681_s4  ;;  %783 = vrot.lane.b32.xlu0 %v3138_v57, %s2681_s4 }
  0xc1   : > { %v3144_v16 = vpop.permute.xlu1 %545  ;;  %v3146_v17 = vpop.permute.xlu0 %543 }
  0xc2   : > { %4350 = vst [vmem:[#allocation35_spill] sm:$0xff] %v3144_v16  ;;  %4351 = vst [vmem:[#allocation36_spill] sm:$0xff] %v3146_v17  ;;  %v3195_v17 = vld [vmem:[%s2762_s28 + $0x158] sm:$0xff]  ;;  %v3198_v16 = vld [vmem:[%s2762_s28 + $0x150] sm:$0xff] }
  0xc3   : > { %789 = vrot.lane.b32.xlu1 %v3149_v41, %s2681_s4  ;;  %787 = vrot.lane.b32.xlu0 %v3152_v25, %s2681_s4  ;;  %4358 = vst [vmem:[#allocation43_spill] sm:$0xff] %v3195_v17  ;;  %4359 = vst [vmem:[#allocation44_spill] sm:$0xff] %v3198_v16 }
  0xc5   : > { %v3158_v38 = vpop.permute.xlu1 %549  ;;  %v3160_v54 = vpop.permute.xlu0 %547 }
  0xc6   : > { %4352 = vst [vmem:[#allocation37_spill] sm:$0xff] %v3158_v38  ;;  %4353 = vst [vmem:[#allocation38_spill] sm:$0xff] %v3160_v54 }
  0xc7   : > { %793 = vrot.lane.b32.xlu1 %v3163_v55, %s2681_s4  ;;  %791 = vrot.lane.b32.xlu0 %v3166_v22, %s2681_s4 }
  0xc9   : > { %v554_v36 = vpop.permute.xlu1 %553  ;;  %v552_v52 = vpop.permute.xlu0 %551 }
  0xca   : > { %v3181_v37 = vsel %vm1483_vm0, %v200_v39, %v554_v36  ;;  %v3184_v21 = vsel %vm1483_vm0, %v199_v23, %v552_v52 }
  0xcb   : > { %4354 = vst [vmem:[#allocation39_spill] sm:$0xff] %v3181_v37  ;;  %4355 = vst [vmem:[#allocation40_spill] sm:$0xff] %v3184_v21  ;;  %797 = vrot.lane.b32.xlu1 %v3175_v53, %s2681_s4  ;;  %795 = vrot.lane.b32.xlu0 %v3178_v20, %s2681_s4  ;;  %v1489_v21 = vsel %vm1483_vm0, %v3031_v33, %v3006_v24  ;;  %v1488_v37 = vsel %vm1483_vm0, %v3034_v40, %v3008_v26 }
  0xcc   : > { %v1490_v24 = vsel %vm1483_vm0, %v3048_v45, %v3014_v28 }
  0xcd   : > { %v3190_v54 = vpop.permute.xlu1 %621  ;;  %v3192_v38 = vpop.permute.xlu0 %619 }
  0xce   : > { %4356 = vst [vmem:[#allocation41_spill] sm:$0xff] %v3190_v54  ;;  %4357 = vst [vmem:[#allocation42_spill] sm:$0xff] %v3192_v38  ;;  %v2262_v54 = vld [vmem:[%s2762_s28 + $0x188] sm:$0xff]  ;;  %v2261_v38 = vld [vmem:[%s2762_s28 + $0x180] sm:$0xff] }
  0xcf   : > { %801 = vrot.lane.b32.xlu1 %v3195_v17, %s2681_s4  ;;  %799 = vrot.lane.b32.xlu0 %v3198_v16, %s2681_s4 }
  0xd1   : > { %v3204_v36 = vpop.permute.xlu1 %625  ;;  %v3206_v52 = vpop.permute.xlu0 %623 }
  0xd2   : > { %4360 = vst [vmem:[#allocation45_spill] sm:$0xff] %v3204_v36  ;;  %4361 = vst [vmem:[#allocation46_spill] sm:$0xff] %v3206_v52 }
  0xd3   : > { %805 = vrot.lane.b32.xlu1 %v200_v39, %s2681_s4  ;;  %803 = vrot.lane.b32.xlu0 %v199_v23, %s2681_s4  ;;  %v1491_v23 = vsel %vm1483_vm0, %v3045_v44, %v3012_v27 }
  0xd5   : > { %v630_v16 = vpop.permute.xlu1 %629  ;;  %v628_v17 = vpop.permute.xlu0 %627 }
  0xd6   : > { %v3219_v36 = vsel %vm1516_vm1, %v1489_v21, %v630_v16  ;;  %v3222_v39 = vsel %vm1516_vm1, %v1488_v37, %v628_v17 }
  0xd7   : > { %809 = vrot.lane.b32.xlu1 %v2262_v54, %s2681_s4  ;;  %807 = vrot.lane.b32.xlu0 %v2261_v38, %s2681_s4  ;;  %v1493_v38 = vsel %vm1483_vm0, %v3057_v58, %v3026_v31  ;;  %v1492_v54 = vsel %vm1483_vm0, %v3060_v59, %v3028_v32 }
  0xd9   : > { %v634_v26 = vpop.permute.xlu1 %633  ;;  %v632_v52 = vpop.permute.xlu0 %631 }
  0xda   : > { %v3233_v21 = vsel %vm1516_vm1, %v1491_v23, %v634_v26  ;;  %v3236_v37 = vsel %vm1516_vm1, %v1490_v24, %v632_v52 }
  0xdb   : > { %877 = vrot.lane.b32.xlu1 %v2772_v2, %s2682_s5  ;;  %875 = vrot.lane.b32.xlu0 %v2765_v0, %s2682_s5  ;;  %v1495_v0 = vsel %vm1483_vm0, %v3075_v29, %v3040_v42  ;;  %v1494_v2 = vsel %vm1483_vm0, %v3078_v60, %v3042_v43 }
  0xdd   : > { %v638_v27 = vpop.permute.xlu1 %637  ;;  %v636_v28 = vpop.permute.xlu0 %635 }
  0xde   : > { %v3249_v16 = vsel %vm1516_vm1, %v1493_v38, %v638_v27  ;;  %v3252_v17 = vsel %vm1516_vm1, %v1492_v54, %v636_v28 }
  0xdf   : > { %881 = vrot.lane.b32.xlu1 %v2779_v4, %s2682_s5  ;;  %879 = vrot.lane.b32.xlu0 %v2782_v5, %s2682_s5 }
  0xe1   : > { %v642_v31 = vpop.permute.xlu1 %641  ;;  %v640_v32 = vpop.permute.xlu0 %639 }
  0xe2   : > { %v3265_v52 = vsel %vm1516_vm1, %v1495_v0, %v642_v31  ;;  %v3268_v23 = vsel %vm1516_vm1, %v1494_v2, %v640_v32 }
  0xe3   : > { %885 = vrot.lane.b32.xlu1 %v2789_v6, %s2682_s5  ;;  %883 = vrot.lane.b32.xlu0 %v2792_v7, %s2682_s5 }
  0xe5   : > { %v646_v24 = vpop.permute.xlu1 %645  ;;  %v644_v42 = vpop.permute.xlu0 %643 }
  0xe6   : > { %v3276_v26 = vsel %vm1516_vm1, %v3063_v62, %v646_v24  ;;  %v3280_v43 = vsel %vm1516_vm1, %v3066_v63, %v644_v42 }
  0xe7   : > { %889 = vrot.lane.b32.xlu1 %v2799_v8, %s2682_s5  ;;  %887 = vrot.lane.b32.xlu0 %v2802_v9, %s2682_s5 }
  0xe9   : > { %v650_v38 = vpop.permute.xlu1 %649  ;;  %v648_v54 = vpop.permute.xlu0 %647 }
  0xea   : > { %v3288_v27 = vsel %vm1516_vm1, %v3081_v48, %v650_v38  ;;  %v3292_v62 = vsel %vm1516_vm1, %v3084_v49, %v648_v54 }
  0xeb   : > { %893 = vrot.lane.b32.xlu1 %v2809_v10, %s2682_s5  ;;  %891 = vrot.lane.b32.xlu0 %v2812_v11, %s2682_s5  ;;  %v1505_v10 = vsel %vm1483_vm0, %v3135_v61, %v3102_v56  ;;  %v1504_v11 = vsel %vm1483_vm0, %v3138_v57, %v3104_v3 }
  0xed   : > { %v3298_v8 = vpop.permute.xlu1 %653  ;;  %v3300_v63 = vpop.permute.xlu0 %651 }
  0xef   : > { %897 = vrot.lane.b32.xlu1 %v2819_v12, %s2682_s5  ;;  %895 = vrot.lane.b32.xlu0 %v2822_v13, %s2682_s5 }
  0xf1   : > { %v3306_v9 = vpop.permute.xlu1 %657  ;;  %v3308_v48 = vpop.permute.xlu0 %655 }
  0xf3   : > { %901 = vrot.lane.b32.xlu1 %v2829_v14, %s2682_s5  ;;  %899 = vrot.lane.b32.xlu0 %v2832_v15, %s2682_s5  ;;  %v1507_v14 = vsel %vm1483_vm0, %v3149_v41, %v3116_v46  ;;  %v1506_v15 = vsel %vm1483_vm0, %v3152_v25, %v3118_v47 }
  0xf5   : > { %v662_v12 = vpop.permute.xlu1 %661  ;;  %v660_v13 = vpop.permute.xlu0 %659 }
  0xf6   : > { %v3321_v49 = vsel %vm1516_vm1, %v1505_v10, %v662_v12  ;;  %v3324_v28 = vsel %vm1516_vm1, %v1504_v11, %v660_v13  ;;  %v4366_v11 = vld [vmem:[#allocation38_spill] sm:$0xff]  ;;  %v4367_v12 = vld [vmem:[#allocation44_spill] sm:$0xff] }
  0xf7   : > { %909 = vrot.lane.b32.xlu1 %v2843_v18, %s2682_s5  ;;  %907 = vrot.lane.b32.xlu0 %v2846_v19, %s2682_s5  ;;  %v1509_v18 = vsel %vm1483_vm0, %v3163_v55, %v3130_v30  ;;  %v1508_v19 = vsel %vm1483_vm0, %v3166_v22, %v3132_v1  ;;  %v4363_v30 = vld [vmem:[#allocation36_spill] sm:$0xff]  ;;  %v1512_v13 = vsel %vm1483_vm0, %v4367_v12, %v4366_v11 }
  0xf8   : > { %v1510_v1 = vsel %vm1483_vm0, %v3178_v20, %v4363_v30 }
  0xf9   : > { %v666_v56 = vpop.permute.xlu1 %665  ;;  %v664_v3 = vpop.permute.xlu0 %663 }
  0xfa   : > { %v3337_v0 = vsel %vm1516_vm1, %v1507_v14, %v666_v56  ;;  %v3340_v2 = vsel %vm1516_vm1, %v1506_v15, %v664_v3 }
  0xfb   : > { %1035 = vrot.lane.b32.xlu1 %v2952_v51, %s2683_s6  ;;  %1003 = vrot.lane.b32.xlu0 %v2899_v35, %s2683_s6  ;;  %v4362_v35 = vld [vmem:[#allocation35_spill] sm:$0xff] }
  0xfc   : > { %v1511_v51 = vsel %vm1483_vm0, %v3175_v53, %v4362_v35 }
  0xfd   : > { %v670_v46 = vpop.permute.xlu1 %669  ;;  %v668_v47 = vpop.permute.xlu0 %667 }
  0xfe   : > { %v3353_v31 = vsel %vm1516_vm1, %v1509_v18, %v670_v46  ;;  %v3356_v32 = vsel %vm1516_vm1, %v1508_v19, %v668_v47  ;;  %v4368_v19 = vld [vmem:[#allocation39_spill] sm:$0xff]  ;;  %v4369_v47 = vld [vmem:[#allocation40_spill] sm:$0xff] }
  0xff   : > { %1037 = vrot.lane.b32.xlu1 %v2949_v50, %s2683_s6  ;;  %1005 = vrot.lane.b32.xlu0 %v2896_v34, %s2683_s6  ;;  %v4364_v34 = vld [vmem:[#allocation37_spill] sm:$0xff]  ;;  %v4365_v50 = vld [vmem:[#allocation43_spill] sm:$0xff] }
 0x100   : > { %v1513_v10 = vsel %vm1483_vm0, %v4365_v50, %v4364_v34  ;;  %v1747_v34 = vld [vmem:[%s4274_s1] sm:$0xff] }
 0x101   : > { %v674_v24 = vpop.permute.xlu1 %673  ;;  %v672_v42 = vpop.permute.xlu0 %671 }
 0x102   : > { %v3369_v38 = vsel %vm1516_vm1, %v1511_v51, %v674_v24  ;;  %v3372_v54 = vsel %vm1516_vm1, %v1510_v1, %v672_v42  ;;  %v1749_v51 = vld [vmem:[%s4274_s1 + $0x10] sm:$0xff]  ;;  %v1748_v24 = vld [vmem:[%s4274_s1 + $0x8] sm:$0xff] }
 0x103   : > { %1163 = vrot.lane.b32.xlu1 %v3138_v57, %s2684_s7  ;;  %1131 = vrot.lane.b32.xlu0 %v3034_v40, %s2684_s7  ;;  %v1751_v57 = vld [vmem:[%s4274_s1 + $0x20] sm:$0xf] }
 0x104   : > { %2500 = vmatprep.subr.msk.mxu0 %vm1856_vm2, %v1751_v57  ;;  %2558 = vmatprep.subr.msk.mxu1 %vm1856_vm2, %v1751_v57 }
 0x105   : > { %v678_v14 = vpop.permute.xlu1 %677  ;;  %v676_v15 = vpop.permute.xlu0 %675  ;;  %2501 = vmatpush3.msk.msra.mxu0 %vm1856_vm2, %v1751_v57  ;;  %2563 = vmatpush3.msk.msra.mxu1 %vm1856_vm2, %v1751_v57  ;;  %v4373_v57 = vld [vmem:[#allocation16_spill] sm:$0xff] }
 0x106   : > { %v3385_v56 = vsel %vm1516_vm1, %v1513_v10, %v678_v14  ;;  %v3388_v3 = vsel %vm1516_vm1, %v1512_v13, %v676_v15  ;;  %v4372_v10 = vld [vmem:[#allocation5_spill] sm:$0xff] }
 0x107   : > { %1165 = vrot.lane.b32.xlu1 %v3135_v61, %s2684_s7  ;;  %1133 = vrot.lane.b32.xlu0 %v3031_v33, %s2684_s7  ;;  %v1750_v61 = vld [vmem:[%s4274_s1 + $0x18] sm:$0xff]  ;;  %v4370_v33 = vld [vmem:[#allocation6_spill] sm:$0xff] }
 0x108   : > { %2502 = vmatprep.subr.mxu0 %v1750_v61  ;;  %2559 = vmatprep.subr.mxu1 %v1750_v61 }
 0x109   : > { %v682_v40 = vpop.permute.xlu1 %681  ;;  %v680_v18 = vpop.permute.xlu0 %679  ;;  %2503 = vmatpush3.msra.mxu0 %v1750_v61  ;;  %2564 = vmatpush3.msra.mxu1 %v1750_v61 }
 0x10a   : > { %v3399_v46 = vsel %vm1516_vm1, %v4368_v19, %v682_v40  ;;  %v3403_v35 = vsel %vm1516_vm1, %v4369_v47, %v680_v18  ;;  %2504 = vmatprep.subr.mxu0 %v1749_v51  ;;  %2560 = vmatprep.subr.mxu1 %v1749_v51 }
 0x10b   : > { %1291 = vrot.lane.b32.xlu1 %v4370_v33, %s2685_s17  ;;  %1259 = vrot.lane.b32.xlu0 %v2782_v5, %s2685_s17 }
 0x10c   : > { %2505 = vmatpush3.msra.mxu0 %v1749_v51  ;;  %2565 = vmatpush3.msra.mxu1 %v1749_v51 }
 0x10d   : > { %v3415_v30 = vpop.permute.xlu1 %749  ;;  %v3417_v1 = vpop.permute.xlu0 %747  ;;  %2506 = vmatprep.subr.mxu0 %v1748_v24  ;;  %2561 = vmatprep.subr.mxu1 %v1748_v24 }
 0x10e   : > { %2507 = vmatpush3.msra.mxu0 %v1748_v24  ;;  %2566 = vmatpush3.msra.mxu1 %v1748_v24 }
 0x10f   : > { %1261 = vrot.lane.b32.xlu1 %v2779_v4, %s2685_s17  ;;  %911 = vrot.lane.b32.xlu0 %v4370_v33, %s2682_s5  ;;  %v4371_v4 = vld [vmem:[#allocation11_spill] sm:$0xff] }
 0x110   : > { %2508 = vmatprep.subr.mxu0 %v1747_v34  ;;  %2562 = vmatprep.subr.mxu1 %v1747_v34  ;;  %v4374_v33 = vld [vmem:[#allocation15_spill] sm:$0xff] }
 0x111   : > { %v3426_v5 = vpop.permute.xlu1 %753  ;;  %v3428_v42 = vpop.permute.xlu0 %751  ;;  %2509 = vmatpush3.msra.mxu0 %v1747_v34  ;;  %2567 = vmatpush3.msra.mxu1 %v1747_v34 }
 0x113   : > { %1387 = vrot.lane.b32.xlu1 %v4371_v4, %s2686_s29  ;;  %1293 = vrot.lane.b32.xlu0 %v4372_v10, %s2685_s17 }
 0x115   : > { %v758_v11 = vpop.permute.xlu1 %757  ;;  %v756_v13 = vpop.permute.xlu0 %755 }
 0x116   : > { %v3439_v14 = vsel %vm1549_vm3, %v3219_v36, %v758_v11  ;;  %v3443_v15 = vsel %vm1549_vm3, %v3222_v39, %v756_v13 }
 0x117   : > { %913 = vrot.lane.b32.xlu1 %v4372_v10, %s2682_s5  ;;  %1419 = vrot.lane.b32.xlu0 %v4373_v57, %s2686_s29 }
 0x119   : > { %v762_v40 = vpop.permute.xlu1 %761  ;;  %v760_v18 = vpop.permute.xlu0 %759 }
 0x11a   : > { %v3451_v19 = vsel %vm1549_vm3, %v3233_v21, %v762_v40  ;;  %v3455_v36 = vsel %vm1549_vm3, %v3236_v37, %v760_v18  ;;  %v4375_v37 = vld [vmem:[#allocation10_spill] sm:$0xff]  ;;  %v4383_v18 = vld [vmem:[#allocation7_spill] sm:$0xff] }
 0x11b   : > { %1039 = vrot.lane.b32.xlu1 %v4373_v57, %s2683_s6  ;;  %1007 = vrot.lane.b32.xlu0 %v4371_v4, %s2683_s6 }
 0x11d   : > { %v766_v39 = vpop.permute.xlu1 %765  ;;  %v764_v47 = vpop.permute.xlu0 %763 }
 0x11e   : > { %v3463_v61 = vsel %vm1549_vm3, %v3249_v16, %v766_v39  ;;  %v3467_v21 = vsel %vm1549_vm3, %v3252_v17, %v764_v47 }
 0x11f   : > { %1421 = vrot.lane.b32.xlu1 %v4374_v33, %s2686_s29  ;;  %1389 = vrot.lane.b32.xlu0 %v4375_v37, %s2686_s29 }
 0x121   : > { %v770_v51 = vpop.permute.xlu1 %769  ;;  %v768_v24 = vpop.permute.xlu0 %767 }
 0x122   : > { %v3475_v34 = vsel %vm1549_vm3, %v3265_v52, %v770_v51  ;;  %v3479_v16 = vsel %vm1549_vm3, %v3268_v23, %v768_v24 }
 0x123   : > { %4376 = vst [vmem:[#allocation35_spill] sm:$0xff] %v3475_v34  ;;  %1041 = vrot.lane.b32.xlu1 %v4374_v33, %s2683_s6  ;;  %1009 = vrot.lane.b32.xlu0 %v4375_v37, %s2683_s6  ;;  %v4403_v34 = vld [vmem:[#allocation32_spill] sm:$0xff] }
 0x125   : > { %v774_v17 = vpop.permute.xlu1 %773  ;;  %v772_v4 = vpop.permute.xlu0 %771 }
 0x126   : > { %v3487_v10 = vsel %vm1549_vm3, %v3276_v26, %v774_v17  ;;  %v3491_v52 = vsel %vm1549_vm3, %v3280_v43, %v772_v4  ;;  %v4387_v4 = vld [vmem:[#allocation17_spill] sm:$0xff] }
 0x127   : > { %4377 = vst [vmem:[#allocation36_spill] sm:$0xff] %v3487_v10  ;;  %4378 = vst [vmem:[#allocation37_spill] sm:$0xff] %v3491_v52  ;;  %1167 = vrot.lane.b32.xlu1 %v3152_v25, %s2684_s7  ;;  %1135 = vrot.lane.b32.xlu0 %v3048_v45, %s2684_s7  ;;  %v4381_v45 = vld [vmem:[#allocation8_spill] sm:$0xff] }
 0x129   : > { %v778_v23 = vpop.permute.xlu1 %777  ;;  %v776_v11 = vpop.permute.xlu0 %775 }
 0x12a   : > { %v3499_v13 = vsel %vm1549_vm3, %v3288_v27, %v778_v23  ;;  %v3503_v26 = vsel %vm1549_vm3, %v3292_v62, %v776_v11 }
 0x12b   : > { %4379 = vst [vmem:[#allocation43_spill] sm:$0xff] %v3499_v13  ;;  %4380 = vst [vmem:[#allocation38_spill] sm:$0xff] %v3503_v26  ;;  %1169 = vrot.lane.b32.xlu1 %v3149_v41, %s2684_s7  ;;  %1137 = vrot.lane.b32.xlu0 %v3045_v44, %s2684_s7 }
 0x12d   : > { %v3509_v25 = vpop.permute.xlu1 %781  ;;  %v3511_v43 = vpop.permute.xlu0 %779 }
 0x12f   : > { %1295 = vrot.lane.b32.xlu1 %v4381_v45, %s2685_s17  ;;  %1263 = vrot.lane.b32.xlu0 %v2792_v7, %s2685_s17  ;;  %v4382_v7 = vld [vmem:[#allocation13_spill] sm:$0xff] }
 0x131   : > { %v3517_v27 = vpop.permute.xlu1 %785  ;;  %v3519_v62 = vpop.permute.xlu0 %783 }
 0x133   : > { %1265 = vrot.lane.b32.xlu1 %v2789_v6, %s2685_s17  ;;  %915 = vrot.lane.b32.xlu0 %v4381_v45, %s2682_s5 }
 0x135   : > { %v790_v41 = vpop.permute.xlu1 %789  ;;  %v788_v44 = vpop.permute.xlu0 %787 }
 0x136   : > { %v3527_v57 = vsel %vm1549_vm3, %v3321_v49, %v790_v41  ;;  %v3531_v40 = vsel %vm1549_vm3, %v3324_v28, %v788_v44  ;;  %v4384_v28 = vld [vmem:[#allocation18_spill] sm:$0xff] }
 0x137   : > { %1391 = vrot.lane.b32.xlu1 %v4382_v7, %s2686_s29  ;;  %1297 = vrot.lane.b32.xlu0 %v4383_v18, %s2685_s17 }
 0x139   : > { %v794_v6 = vpop.permute.xlu1 %793  ;;  %v792_v39 = vpop.permute.xlu0 %791 }
 0x13a   : > { %v3539_v47 = vsel %vm1549_vm3, %v3337_v0, %v794_v6  ;;  %v3543_v49 = vsel %vm1549_vm3, %v3340_v2, %v792_v39  ;;  %v2285_v6 = vld [vmem:[%s2762_s28 + $0x121] sm:$0xff] }
 0x13b   : > { %917 = vrot.lane.b32.xlu1 %v4383_v18, %s2682_s5  ;;  %1423 = vrot.lane.b32.xlu0 %v4384_v28, %s2686_s29 }
 0x13d   : > { %v798_v33 = vpop.permute.xlu1 %797  ;;  %v796_v37 = vpop.permute.xlu0 %795 }
 0x13e   : > { %v3551_v51 = vsel %vm1549_vm3, %v3353_v31, %v798_v33  ;;  %v3555_v0 = vsel %vm1549_vm3, %v3356_v32, %v796_v37  ;;  %v4388_v32 = vld [vmem:[#allocation12_spill] sm:$0xff]  ;;  %v4394_v37 = vld [vmem:[#allocation14_spill] sm:$0xff] }
 0x13f   : > { %1043 = vrot.lane.b32.xlu1 %v4384_v28, %s2683_s6  ;;  %1011 = vrot.lane.b32.xlu0 %v4382_v7, %s2683_s6 }
 0x141   : > { %v802_v2 = vpop.permute.xlu1 %801  ;;  %v800_v24 = vpop.permute.xlu0 %799 }
 0x142   : > { %v3563_v17 = vsel %vm1549_vm3, %v3369_v38, %v802_v2  ;;  %v3567_v31 = vsel %vm1549_vm3, %v3372_v54, %v800_v24 }
 0x143   : > { %4385 = vst [vmem:[#allocation44_spill] sm:$0xff] %v3563_v17  ;;  %4386 = vst [vmem:[#allocation39_spill] sm:$0xff] %v3567_v31  ;;  %1425 = vrot.lane.b32.xlu1 %v4387_v4, %s2686_s29  ;;  %1393 = vrot.lane.b32.xlu0 %v4388_v32, %s2686_s29 }
 0x145   : > { %v806_v23 = vpop.permute.xlu1 %805  ;;  %v804_v11 = vpop.permute.xlu0 %803 }
 0x146   : > { %v3575_v45 = vsel %vm1549_vm3, %v3385_v56, %v806_v23  ;;  %v3579_v38 = vsel %vm1549_vm3, %v3388_v3, %v804_v11  ;;  %v2396_v11 = vld [vmem:[%s2762_s28 + $0x6a] sm:$0xff] }
 0x147   : > { %4389 = vst [vmem:[#allocation40_spill] sm:$0xff] %v3575_v45  ;;  %4390 = vst [vmem:[#allocation6_spill] sm:$0xff] %v3579_v38  ;;  %1045 = vrot.lane.b32.xlu1 %v4387_v4, %s2683_s6  ;;  %1013 = vrot.lane.b32.xlu0 %v4388_v32, %s2683_s6  ;;  %v4395_v4 = vld [vmem:[#allocation20_spill] sm:$0xff] }
 0x149   : > { %v810_v54 = vpop.permute.xlu1 %809  ;;  %v808_v41 = vpop.permute.xlu0 %807 }
 0x14a   : > { %v3587_v44 = vsel %vm1549_vm3, %v3399_v46, %v810_v54  ;;  %v3591_v56 = vsel %vm1549_vm3, %v3403_v35, %v808_v41  ;;  %v2363_v46 = vld [vmem:[%s2762_s28 + $0x61] sm:$0xff] }
 0x14b   : > { %4391 = vst [vmem:[#allocation11_spill] sm:$0xff] %v3587_v44  ;;  %4392 = vst [vmem:[#allocation5_spill] sm:$0xff] %v3591_v56  ;;  %1171 = vrot.lane.b32.xlu1 %v3166_v22, %s2684_s7  ;;  %1139 = vrot.lane.b32.xlu0 %v3060_v59, %s2684_s7  ;;  %v4393_v22 = vld [vmem:[#allocation9_spill] sm:$0xff]  ;;  %v2364_v59 = vld [vmem:[%s2762_s28 + $0x69] sm:$0xff] }
 0x14c   : > { %v2382_v56 = vld [vmem:[%s2762_s28 + $0x141] sm:$0xff] }
 0x14d   : > { %v3597_v3 = vpop.permute.xlu1 %877  ;;  %v3599_v7 = vpop.permute.xlu0 %875 }
 0x14f   : > { %1173 = vrot.lane.b32.xlu1 %v3163_v55, %s2684_s7  ;;  %1141 = vrot.lane.b32.xlu0 %v3057_v58, %s2684_s7  ;;  %v2380_v55 = vld [vmem:[%s2762_s28 + $0x129] sm:$0xff] }
 0x151   : > { %v3606_v35 = vpop.permute.xlu1 %881  ;;  %v3608_v18 = vpop.permute.xlu0 %879 }
 0x153   : > { %1299 = vrot.lane.b32.xlu1 %v4393_v22, %s2685_s17  ;;  %1267 = vrot.lane.b32.xlu0 %v2363_v46, %s2685_s17  ;;  %v4399_v46 = vld [vmem:[#allocation19_spill] sm:$0xff] }
 0x155   : > { %v3615_v39 = vpop.permute.xlu1 %885  ;;  %v3617_v28 = vpop.permute.xlu0 %883 }
 0x157   : > { %1269 = vrot.lane.b32.xlu1 %v2364_v59, %s2685_s17  ;;  %919 = vrot.lane.b32.xlu0 %v2285_v6, %s2682_s5 }
 0x159   : > { %v3622_v58 = vpop.permute.xlu1 %889  ;;  %v3624_v33 = vpop.permute.xlu0 %887 }
 0x15b   : > { %1395 = vrot.lane.b32.xlu1 %v4394_v37, %s2686_s29  ;;  %1301 = vrot.lane.b32.xlu0 %v2380_v55, %s2685_s17 }
 0x15d   : > { %v3629_v2 = vpop.permute.xlu1 %893  ;;  %v3631_v24 = vpop.permute.xlu0 %891 }
 0x15f   : > { %921 = vrot.lane.b32.xlu1 %v2380_v55, %s2682_s5  ;;  %1427 = vrot.lane.b32.xlu0 %v4395_v4, %s2686_s29 }
 0x161   : > { %v3636_v32 = vpop.permute.xlu1 %897  ;;  %v3638_v23 = vpop.permute.xlu0 %895 }
 0x162   : > { %4396 = vst [vmem:[#allocation16_spill] sm:$0xff] %v3636_v32 }
 0x163   : > { %1047 = vrot.lane.b32.xlu1 %v4395_v4, %s2683_s6  ;;  %1015 = vrot.lane.b32.xlu0 %v4394_v37, %s2683_s6 }
 0x165   : > { %v3645_v54 = vpop.permute.xlu1 %901  ;;  %v3647_v41 = vpop.permute.xlu0 %899 }
 0x166   : > { %4397 = vst [vmem:[#allocation15_spill] sm:$0xff] %v3645_v54  ;;  %4398 = vst [vmem:[#allocation10_spill] sm:$0xff] %v3647_v41  ;;  %v4400_v54 = vld [vmem:[#allocation22_spill] sm:$0xff] }
 0x167   : > { %1429 = vrot.lane.b32.xlu1 %v4399_v46, %s2686_s29  ;;  %1397 = vrot.lane.b32.xlu0 %v2396_v11, %s2686_s29 }
 0x169   : > { %v3652_v22 = vpop.permute.xlu1 %909  ;;  %v908_v59 = vpop.permute.xlu0 %907 }
 0x16b   : > { %1049 = vrot.lane.b32.xlu1 %v4399_v46, %s2683_s6  ;;  %1017 = vrot.lane.b32.xlu0 %v2396_v11, %s2683_s6  ;;  %v2381_v11 = vld [vmem:[%s2762_s28 + $0x139] sm:$0xff] }
 0x16c   : > { %v2365_v46 = vld [vmem:[%s2762_s28 + $0x79] sm:$0xff] }
 0x16d   : > { %v1036_v6 = vpop.permute.xlu1 %1035  ;;  %v1004_v55 = vpop.permute.xlu0 %1003 }
 0x16f   : > { %1175 = vrot.lane.b32.xlu1 %v3178_v20, %s2684_s7  ;;  %1143 = vrot.lane.b32.xlu0 %v3078_v60, %s2684_s7  ;;  %v2366_v60 = vld [vmem:[%s2762_s28 + $0x81] sm:$0xff] }
 0x171   : > { %v3661_v37 = vpop.permute.xlu1 %1037  ;;  %v3663_v4 = vpop.permute.xlu0 %1005 }
 0x173   : > { %1177 = vrot.lane.b32.xlu1 %v3175_v53, %s2684_s7  ;;  %1145 = vrot.lane.b32.xlu0 %v3075_v29, %s2684_s7  ;;  %v169_v53 = vld [vmem:[%s2762_s28] sm:$0xff] }
 0x174   : > { %v2397_v29 = vld [vmem:[%s2762_s28 + $0x7a] sm:$0xff]  ;;  %v1484_v38 = vsel %vm1483_vm0, %v169_v53, %v4400_v54 }
 0x175   : > { %v1164_v13 = vpop.permute.xlu1 %1163  ;;  %v1132_v20 = vpop.permute.xlu0 %1131  ;;  %v4402_v53 = vld [vmem:[#allocation28_spill] sm:$0xff] }
 0x176   : > { %v1500_v32 = vsel %vm1483_vm0, %v4403_v34, %v4402_v53  ;;  %v4404_v53 = vld [vmem:[#allocation24_spill] sm:$0xff] }
 0x177   : > { %1303 = vrot.lane.b32.xlu1 %v2381_v11, %s2685_s17  ;;  %1271 = vrot.lane.b32.xlu0 %v2365_v46, %s2685_s17  ;;  %v4401_v46 = vld [vmem:[#allocation42_spill] sm:$0xff] }
 0x178   : > { %v1517_v52 = vsel %vm1516_vm1, %v1484_v38, %v4401_v46 }
 0x179   : > { %v3674_v44 = vpop.permute.xlu1 %1165  ;;  %v3676_v26 = vpop.permute.xlu0 %1133 }
 0x17b   : > { %1273 = vrot.lane.b32.xlu1 %v2366_v60, %s2685_s17  ;;  %923 = vrot.lane.b32.xlu0 %v2381_v11, %s2682_s5  ;;  %v2413_v60 = vld [vmem:[%s2762_s28 + $0x13a] sm:$0xff]  ;;  %v1550_v11 = vsel %vm1549_vm3, %v1517_v52, %v3417_v1  ;;  %v1533_v1 = vsel %vm1516_vm1, %v1500_v32, %v3300_v63  ;;  %v170_v63 = vld [vmem:[%s2762_s28 + $0x8] sm:$0xff] }
 0x17c   : > { %v1583_v54 = vsel %vm1582_vm4, %v1550_v11, %v3599_v7  ;;  %v1566_v38 = vsel %vm1549_vm3, %v1533_v1, %v3511_v43  ;;  %v2414_v43 = vld [vmem:[%s2762_s28 + $0x142] sm:$0xff]  ;;  %v4406_v1 = vld [vmem:[#allocation31_spill] sm:$0xff] }
 0x17d   : > { %v1292_v45 = vpop.permute.xlu1 %1291  ;;  %v1260_v10 = vpop.permute.xlu0 %1259  ;;  %v1616_v31 = vsel %vm1615_vm5, %v1583_v54, %v1004_v55 }
 0x17e   : > { %v1649_v52 = vsel %vm1648_vm6, %v1616_v31, %v1132_v20 }
 0x17f   : > { %1399 = vrot.lane.b32.xlu1 %v2397_v29, %s2686_s29  ;;  %1305 = vrot.lane.b32.xlu0 %v2382_v56, %s2685_s17  ;;  %v1682_v34 = vsel %vm1681_vm7, %v1649_v52, %v1260_v10  ;;  %v2398_v10 = vld [vmem:[%s2762_s28 + $0x82] sm:$0xff] }
 0x181   : > { %v1262_v41 = vpop.permute.xlu1 %1261  ;;  %v3692_v17 = vpop.permute.xlu0 %911 }
 0x183   : > { %925 = vrot.lane.b32.xlu1 %v2382_v56, %s2682_s5  ;;  %1431 = vrot.lane.b32.xlu0 %v2413_v60, %s2686_s29  ;;  %v1599_v56 = vsel %vm1582_vm4, %v1566_v38, %v908_v59 }
 0x184   : > { %v1632_v11 = vsel %vm1615_vm5, %v1599_v56, %v1036_v6  ;;  %v1485_v6 = vsel %vm1483_vm0, %v170_v63, %v4404_v53 }
 0x185   : > { %v1388_v7 = vpop.permute.xlu1 %1387  ;;  %v1294_v55 = vpop.permute.xlu0 %1293  ;;  %v1665_v31 = vsel %vm1648_vm6, %v1632_v11, %v1164_v13  ;;  %v4407_v13 = vld [vmem:[#allocation41_spill] sm:$0xff] }
 0x186   : > { %v1715_v46 = vsel %vm1714_vm8, %v1682_v34, %v1388_v7  ;;  %v1698_v32 = vsel %vm1681_vm7, %v1665_v31, %v1292_v45  ;;  %v1518_v45 = vsel %vm1516_vm1, %v1485_v6, %v4407_v13  ;;  %v4408_v13 = vld [vmem:[#allocation21_spill] sm:$0xff] }
 0x187   : > { %1051 = vrot.lane.b32.xlu1 %v2413_v60, %s2683_s6  ;;  %1019 = vrot.lane.b32.xlu0 %v2397_v29, %s2683_s6  ;;  %v4405_v60 = vld [vmem:[#allocation27_spill] sm:$0xff]  ;;  %v1551_v38 = vsel %vm1549_vm3, %v1518_v45, %v3415_v30  ;;  %v4409_v45 = vld [vmem:[#allocation25_spill] sm:$0xff] }
 0x188   : > { %2510 = vmatprep.mubr.msk.f32.mxu0 %vm1759_vm9, %v1715_v46  ;;  %v1501_v29 = vsel %vm1483_vm0, %v4406_v1, %v4405_v60  ;;  %v1584_v46 = vsel %vm1582_vm4, %v1551_v38, %v3597_v3  ;;  %v2335_v3 = vld [vmem:[%s2762_s28 + $0x90] sm:$0xff]  ;;  %v4410_v38 = vld [vmem:[#allocation46_spill] sm:$0xff] }
 0x189   : > { %v3719_v20 = vpop.permute.xlu1 %913  ;;  %v1420_v59 = vpop.permute.xlu0 %1419  ;;  %v1534_v52 = vsel %vm1516_vm1, %v1501_v29, %v3298_v8  ;;  %v1617_v63 = vsel %vm1615_vm5, %v1584_v46, %v3663_v4  ;;  %v2399_v60 = vld [vmem:[%s2762_s28 + $0x92] sm:$0xff] }
 0x18a   : > { %v1731_v54 = vsel %vm1714_vm8, %v1698_v32, %v1420_v59  ;;  %v1567_v34 = vsel %vm1549_vm3, %v1534_v52, %v3509_v25  ;;  %v1650_v25 = vsel %vm1648_vm6, %v1617_v63, %v3676_v26  ;;  %v2336_v26 = vld [vmem:[%s2762_s28 + $0x98] sm:$0xff]  ;;  %v1486_v52 = vsel %vm1483_vm0, %v4409_v45, %v4408_v13  ;;  %v4414_v13 = vld [vmem:[#allocation26_spill] sm:$0xff]  ;;  %v4415_v45 = vld [vmem:[#allocation29_spill] sm:$0xff] }
 0x18b   : > { %1433 = vrot.lane.b32.xlu1 %v2414_v43, %s2686_s29  ;;  %1401 = vrot.lane.b32.xlu0 %v2398_v10, %s2686_s29  ;;  %v1600_v11 = vsel %vm1582_vm4, %v1567_v34, %v3652_v22  ;;  %v1683_v22 = vsel %vm1681_vm7, %v1650_v25, %v1262_v41  ;;  %v1519_v34 = vsel %vm1516_vm1, %v1486_v52, %v4410_v38  ;;  %v2415_v46 = vld [vmem:[%s2762_s28 + $0x152] sm:$0xff]  ;;  %v4411_v25 = vld [vmem:[#allocation30_spill] sm:$0xff]  ;;  %v4416_v52 = vld [vmem:[#allocation33_spill] sm:$0xff] }
 0x18c   : > { %2534 = vmatprep.mubr.msk.f32.mxu1 %vm1759_vm9, %v1731_v54  ;;  %v1633_v8 = vsel %vm1615_vm5, %v1600_v11, %v3661_v37  ;;  %v2368_v54 = vld [vmem:[%s2762_s28 + $0x99] sm:$0xff]  ;;  %v1552_v11 = vsel %vm1549_vm3, %v1519_v34, %v3428_v42 }
 0x18d   : > { %v3738_v7 = vpop.permute.xlu1 %1039  ;;  %v1008_v56 = vpop.permute.xlu0 %1007  ;;  %v1666_v30 = vsel %vm1648_vm6, %v1633_v8, %v3674_v44 }
 0x18e   : > { %v1699_v37 = vsel %vm1681_vm7, %v1666_v30, %v1294_v55  ;;  %v2383_v55 = vld [vmem:[%s2762_s28 + $0x151] sm:$0xff]  ;;  %v1585_v30 = vsel %vm1582_vm4, %v1552_v11, %v3608_v18 }
 0x18f   : > { %1053 = vrot.lane.b32.xlu1 %v2414_v43, %s2683_s6  ;;  %1021 = vrot.lane.b32.xlu0 %v2398_v10, %s2683_s6 }
 0x191   : > { %v1422_v31 = vpop.permute.xlu1 %1421  ;;  %v1390_v4 = vpop.permute.xlu0 %1389 }
 0x192   : > { %v1732_v32 = vsel %vm1714_vm8, %v1699_v37, %v1422_v31  ;;  %v1716_v43 = vsel %vm1714_vm8, %v1683_v22, %v1390_v4  ;;  %v1618_v37 = vsel %vm1615_vm5, %v1585_v30, %v1008_v56 }
 0x193   : > { %1179 = vrot.lane.b32.xlu1 %v4367_v12, %s2684_s7  ;;  %1147 = vrot.lane.b32.xlu0 %v2335_v3, %s2684_s7  ;;  %v2367_v12 = vld [vmem:[%s2762_s28 + $0x91] sm:$0xff]  ;;  %v4412_v3 = vld [vmem:[#allocation34_spill] sm:$0xff] }
 0x194   : > { %2511 = vmatmul.mubr.msk.f32.vlgmr.msra.gmra.mxu0 %vm1759_vm9, %v1716_v43  ;;  %2535 = vmatmul.mubr.msk.f32.vlgmr.msra.gmra.mxu1 %vm1759_vm9, %v1732_v32  ;;  %v1502_v22 = vsel %vm1483_vm0, %v4412_v3, %v4411_v25 }
 0x195   : > { %v3765_v44 = vpop.permute.xlu1 %1041  ;;  %v3767_v41 = vpop.permute.xlu0 %1009  ;;  %v1535_v42 = vsel %vm1516_vm1, %v1502_v22, %v3308_v48 }
 0x196   : > { %v1568_v18 = vsel %vm1549_vm3, %v1535_v42, %v3519_v62  ;;  %v2416_v62 = vld [vmem:[%s2762_s28 + $0x15a] sm:$0xff] }
 0x197   : > { %1181 = vrot.lane.b32.xlu1 %v4365_v50, %s2684_s7  ;;  %1149 = vrot.lane.b32.xlu0 %v2336_v26, %s2684_s7  ;;  %v2384_v50 = vld [vmem:[%s2762_s28 + $0x159] sm:$0xff]  ;;  %v1601_v56 = vsel %vm1582_vm4, %v1568_v18, %v3692_v17 }
 0x199   : > { %v1168_v10 = vpop.permute.xlu1 %1167  ;;  %v1136_v59 = vpop.permute.xlu0 %1135 }
 0x19a   : > { %v1651_v31 = vsel %vm1648_vm6, %v1618_v37, %v1136_v59  ;;  %v2337_v37 = vld [vmem:[%s2762_s28 + $0xa8] sm:$0xff] }
 0x19b   : > { %1307 = vrot.lane.b32.xlu1 %v2383_v55, %s2685_s17  ;;  %1275 = vrot.lane.b32.xlu0 %v2367_v12, %s2685_s17  ;;  %v2400_v12 = vld [vmem:[%s2762_s28 + $0x9a] sm:$0xff] }
 0x19d   : > { %v1170_v53 = vpop.permute.xlu1 %1169  ;;  %v1138_v6 = vpop.permute.xlu0 %1137 }
 0x19f   : > { %1277 = vrot.lane.b32.xlu1 %v2368_v54, %s2685_s17  ;;  %927 = vrot.lane.b32.xlu0 %v2383_v55, %s2682_s5  ;;  %v1634_v55 = vsel %vm1615_vm5, %v1601_v56, %v3738_v7 }
 0x1a0   : > { %v1667_v48 = vsel %vm1648_vm6, %v1634_v55, %v1168_v10  ;;  %v4417_v10 = vld [vmem:[#allocation45_spill] sm:$0xff]  ;;  %v2370_v55 = vld [vmem:[%s2762_s28 + $0xb1] sm:$0xff] }
 0x1a1   : > { %v1296_v1 = vpop.permute.xlu1 %1295  ;;  %v1264_v29 = vpop.permute.xlu0 %1263 }
 0x1a2   : > { %v1684_v4 = vsel %vm1681_vm7, %v1651_v31, %v1264_v29  ;;  %v1700_v59 = vsel %vm1681_vm7, %v1667_v48, %v1296_v1  ;;  %v4413_v29 = vld [vmem:[#allocation23_spill] sm:$0xff] }
 0x1a3   : > { %1403 = vrot.lane.b32.xlu1 %v2399_v60, %s2686_s29  ;;  %1309 = vrot.lane.b32.xlu0 %v2384_v50, %s2685_s17  ;;  %v1487_v7 = vsel %vm1483_vm0, %v4414_v13, %v4413_v29  ;;  %v2417_v29 = vld [vmem:[%s2762_s28 + $0x16a] sm:$0xff] }
 0x1a4   : > { %v1520_v1 = vsel %vm1516_vm1, %v1487_v7, %v4417_v10 }
 0x1a5   : > { %v1266_v8 = vpop.permute.xlu1 %1265  ;;  %v3791_v63 = vpop.permute.xlu0 %915  ;;  %v1553_v34 = vsel %vm1549_vm3, %v1520_v1, %v3426_v5 }
 0x1a6   : > { %v1586_v25 = vsel %vm1582_vm4, %v1553_v34, %v3606_v35  ;;  %v2353_v35 = vld [vmem:[%s2762_s28 + $0x168] sm:$0xff]  ;;  %v1603_v34 = vsel %vm1582_vm4, %v3531_v40, %v3791_v63 }
 0x1a7   : > { %929 = vrot.lane.b32.xlu1 %v2384_v50, %s2682_s5  ;;  %1435 = vrot.lane.b32.xlu0 %v2415_v46, %s2686_s29 }
 0x1a9   : > { %v1392_v32 = vpop.permute.xlu1 %1391  ;;  %v1298_v43 = vpop.permute.xlu0 %1297 }
 0x1aa   : > { %v1717_v26 = vsel %vm1714_vm8, %v1684_v4, %v1392_v32  ;;  %v2385_v32 = vld [vmem:[%s2762_s28 + $0x169] sm:$0xff] }
 0x1ab   : > { %1055 = vrot.lane.b32.xlu1 %v2415_v46, %s2683_s6  ;;  %1023 = vrot.lane.b32.xlu0 %v2399_v60, %s2683_s6  ;;  %v1503_v60 = vsel %vm1483_vm0, %v4416_v52, %v4415_v45  ;;  %v1587_v45 = vsel %vm1582_vm4, %v3443_v15, %v3617_v28 }
 0x1ac   : > { %2513 = vmatprep.mubr.msk.f32.mxu0 %vm1759_vm9, %v1717_v26  ;;  %v1536_v38 = vsel %vm1516_vm1, %v1503_v60, %v3306_v9  ;;  %v1619_v9 = vsel %vm1615_vm5, %v1586_v25, %v3767_v41  ;;  %v2402_v25 = vld [vmem:[%s2762_s28 + $0xb2] sm:$0xff] }
 0x1ad   : > { %v3819_v54 = vpop.permute.xlu1 %917  ;;  %v1424_v17 = vpop.permute.xlu0 %1423  ;;  %v1569_v46 = vsel %vm1549_vm3, %v1536_v38, %v3517_v27  ;;  %v1652_v27 = vsel %vm1648_vm6, %v1619_v9, %v1138_v6  ;;  %v2338_v6 = vld [vmem:[%s2762_s28 + $0xb0] sm:$0xff] }
 0x1ae   : > { %v1733_v50 = vsel %vm1714_vm8, %v1700_v59, %v1424_v17  ;;  %v1602_v3 = vsel %vm1582_vm4, %v1569_v46, %v3719_v20  ;;  %v1685_v20 = vsel %vm1681_vm7, %v1652_v27, %v1266_v8  ;;  %v2386_v59 = vld [vmem:[%s2762_s28 + $0x171] sm:$0xff]  ;;  %v1604_v27 = vsel %vm1582_vm4, %v3527_v57, %v3819_v54 }
 0x1af   : > { %1437 = vrot.lane.b32.xlu1 %v2416_v62, %s2686_s29  ;;  %1405 = vrot.lane.b32.xlu0 %v2400_v12, %s2686_s29  ;;  %v1635_v22 = vsel %vm1615_vm5, %v1602_v3, %v3765_v44 }
 0x1b0   : > { %2537 = vmatprep.mubr.msk.f32.mxu1 %vm1759_vm9, %v1733_v50  ;;  %v1668_v5 = vsel %vm1648_vm6, %v1635_v22, %v1170_v53  ;;  %v2354_v53 = vld [vmem:[%s2762_s28 + $0x170] sm:$0xff] }
 0x1b1   : > { %v1044_v11 = vpop.permute.xlu1 %1043  ;;  %v1012_v30 = vpop.permute.xlu0 %1011  ;;  %v1701_v44 = vsel %vm1681_vm7, %v1668_v5, %v1298_v43  ;;  %v2369_v43 = vld [vmem:[%s2762_s28 + $0xa9] sm:$0xff]  ;;  %v1588_v5 = vsel %vm1582_vm4, %v3439_v14, %v3615_v39  ;;  %v2339_v14 = vld [vmem:[%s2762_s28 + $0xc0] sm:$0xff] }
 0x1b2   : > { %v1620_v52 = vsel %vm1615_vm5, %v1587_v45, %v1012_v30  ;;  %v1636_v15 = vsel %vm1615_vm5, %v1603_v34, %v1044_v11  ;;  %v2418_v30 = vld [vmem:[%s2762_s28 + $0x172] sm:$0xff] }
 0x1b3   : > { %1057 = vrot.lane.b32.xlu1 %v2416_v62, %s2683_s6  ;;  %1025 = vrot.lane.b32.xlu0 %v2400_v12, %s2683_s6  ;;  %v2401_v12 = vld [vmem:[%s2762_s28 + $0xaa] sm:$0xff] }
 0x1b5   : > { %v1426_v42 = vpop.permute.xlu1 %1425  ;;  %v1394_v41 = vpop.permute.xlu0 %1393 }
 0x1b6   : > { %v1734_v31 = vsel %vm1714_vm8, %v1701_v44, %v1426_v42  ;;  %v1718_v18 = vsel %vm1714_vm8, %v1685_v20, %v1394_v41  ;;  %v2355_v42 = vld [vmem:[%s2762_s28 + $0x180] sm:$0xff] }
 0x1b7   : > { %1183 = vrot.lane.b32.xlu1 %v2353_v35, %s2684_s7  ;;  %1151 = vrot.lane.b32.xlu0 %v2337_v37, %s2684_s7 }
 0x1b8   : > { %2514 = vmatmul.mubr.msk.f32.gmra.mxu0 %vm1759_vm9, %v1718_v18  ;;  %2538 = vmatmul.mubr.msk.f32.gmra.mxu1 %vm1759_vm9, %v1734_v31 }
 0x1b9   : > { %v1046_v8 = vpop.permute.xlu1 %1045  ;;  %v1014_v4 = vpop.permute.xlu0 %1013 }
 0x1ba   : > { %v1637_v35 = vsel %vm1615_vm5, %v1604_v27, %v1046_v8  ;;  %v1621_v37 = vsel %vm1615_vm5, %v1588_v5, %v1014_v4 }
 0x1bb   : > { %1185 = vrot.lane.b32.xlu1 %v2354_v53, %s2684_s7  ;;  %1153 = vrot.lane.b32.xlu0 %v2338_v6, %s2684_s7  ;;  %v2356_v53 = vld [vmem:[%s2762_s28 + $0x188] sm:$0xff] }
 0x1bc   : > { %v2340_v6 = vld [vmem:[%s2762_s28 + $0xc8] sm:$0xff] }
 0x1bd   : > { %v1172_v56 = vpop.permute.xlu1 %1171  ;;  %v1140_v26 = vpop.permute.xlu0 %1139 }
 0x1be   : > { %v1653_v60 = vsel %vm1648_vm6, %v1620_v52, %v1140_v26  ;;  %v1669_v28 = vsel %vm1648_vm6, %v1636_v15, %v1172_v56  ;;  %v1589_v52 = vsel %vm1582_vm4, %v3455_v36, %v3624_v33 }
 0x1bf   : > { %1311 = vrot.lane.b32.xlu1 %v2385_v32, %s2685_s17  ;;  %1279 = vrot.lane.b32.xlu0 %v2369_v43, %s2685_s17  ;;  %v2371_v43 = vld [vmem:[%s2762_s28 + $0xc1] sm:$0xff] }
 0x1c1   : > { %v1174_v48 = vpop.permute.xlu1 %1173  ;;  %v1142_v62 = vpop.permute.xlu0 %1141 }
 0x1c2   : > { %v1670_v20 = vsel %vm1648_vm6, %v1637_v35, %v1174_v48  ;;  %v1654_v44 = vsel %vm1648_vm6, %v1621_v37, %v1142_v62  ;;  %v2388_v62 = vld [vmem:[%s2762_s28 + $0x189] sm:$0xff] }
 0x1c3   : > { %1281 = vrot.lane.b32.xlu1 %v2370_v55, %s2685_s17  ;;  %931 = vrot.lane.b32.xlu0 %v2385_v32, %s2682_s5  ;;  %v2387_v32 = vld [vmem:[%s2762_s28 + $0x181] sm:$0xff] }
 0x1c5   : > { %v1300_v17 = vpop.permute.xlu1 %1299  ;;  %v1268_v50 = vpop.permute.xlu0 %1267 }
 0x1c6   : > { %v1686_v10 = vsel %vm1681_vm7, %v1653_v60, %v1268_v50  ;;  %v1702_v3 = vsel %vm1681_vm7, %v1669_v28, %v1300_v17  ;;  %v2419_v50 = vld [vmem:[%s2762_s28 + $0x182] sm:$0xff] }
 0x1c7   : > { %1407 = vrot.lane.b32.xlu1 %v2401_v12, %s2686_s29  ;;  %1313 = vrot.lane.b32.xlu0 %v2386_v59, %s2685_s17 }
 0x1c9   : > { %v1270_v13 = vpop.permute.xlu1 %1269  ;;  %v3877_v7 = vpop.permute.xlu0 %919 }
 0x1ca   : > { %v1687_v39 = vsel %vm1681_vm7, %v1654_v44, %v1270_v13 }
 0x1cb   : > { %933 = vrot.lane.b32.xlu1 %v2386_v59, %s2682_s5  ;;  %1439 = vrot.lane.b32.xlu0 %v2417_v29, %s2686_s29 }
 0x1cd   : > { %v1396_v1 = vpop.permute.xlu1 %1395  ;;  %v1302_v38 = vpop.permute.xlu0 %1301 }
 0x1ce   : > { %v1719_v46 = vsel %vm1714_vm8, %v1686_v10, %v1396_v1  ;;  %v1703_v57 = vsel %vm1681_vm7, %v1670_v20, %v1302_v38 }
 0x1cf   : > { %1059 = vrot.lane.b32.xlu1 %v2417_v29, %s2683_s6  ;;  %1027 = vrot.lane.b32.xlu0 %v2401_v12, %s2683_s6  ;;  %v2372_v12 = vld [vmem:[%s2762_s28 + $0xc9] sm:$0xff] }
 0x1d0   : > { %2516 = vmatprep.mubr.msk.f32.mxu0 %vm1759_vm9, %v1719_v46  ;;  %v2403_v29 = vld [vmem:[%s2762_s28 + $0xc2] sm:$0xff]  ;;  %v1605_v46 = vsel %vm1582_vm4, %v3543_v49, %v3877_v7  ;;  %v2420_v49 = vld [vmem:[%s2762_s28 + $0x18a] sm:$0xff] }
 0x1d1   : > { %v3899_v22 = vpop.permute.xlu1 %921  ;;  %v1428_v40 = vpop.permute.xlu0 %1427  ;;  %v2404_v7 = vld [vmem:[%s2762_s28 + $0xca] sm:$0xff] }
 0x1d2   : > { %v1735_v63 = vsel %vm1714_vm8, %v1702_v3, %v1428_v40 }
 0x1d3   : > { %1441 = vrot.lane.b32.xlu1 %v2418_v30, %s2686_s29  ;;  %1409 = vrot.lane.b32.xlu0 %v2402_v25, %s2686_s29 }
 0x1d4   : > { %2540 = vmatprep.mubr.msk.f32.mxu1 %vm1759_vm9, %v1735_v63 }
 0x1d5   : > { %v1048_v11 = vpop.permute.xlu1 %1047  ;;  %v1016_v9 = vpop.permute.xlu0 %1015 }
 0x1d6   : > { %v1622_v60 = vsel %vm1615_vm5, %v1589_v52, %v1016_v9  ;;  %v1638_v33 = vsel %vm1615_vm5, %v1605_v46, %v1048_v11  ;;  %v1590_v11 = vsel %vm1582_vm4, %v3451_v19, %v3622_v58  ;;  %v1606_v9 = vsel %vm1582_vm4, %v3539_v47, %v3899_v22 }
 0x1d7   : > { %1061 = vrot.lane.b32.xlu1 %v2418_v30, %s2683_s6  ;;  %1029 = vrot.lane.b32.xlu0 %v2402_v25, %s2683_s6 }
 0x1d9   : > { %v1430_v54 = vpop.permute.xlu1 %1429  ;;  %v1398_v41 = vpop.permute.xlu0 %1397 }
 0x1da   : > { %v1736_v31 = vsel %vm1714_vm8, %v1703_v57, %v1430_v54  ;;  %v1720_v18 = vsel %vm1714_vm8, %v1687_v39, %v1398_v41  ;;  %v2358_v54 = vld [vmem:[%s2762_s28 + $0x1a0] sm:$0xff] }
 0x1db   : > { %1187 = vrot.lane.b32.xlu1 %v2355_v42, %s2684_s7  ;;  %1155 = vrot.lane.b32.xlu0 %v2339_v14, %s2684_s7  ;;  %v2357_v42 = vld [vmem:[%s2762_s28 + $0x198] sm:$0xff]  ;;  %v2342_v41 = vld [vmem:[%s2762_s28 + $0xe0] sm:$0xff] }
 0x1dc   : > { %2517 = vmatmul.mubr.msk.f32.gmra.mxu0 %vm1759_vm9, %v1720_v18  ;;  %2541 = vmatmul.mubr.msk.f32.gmra.mxu1 %vm1759_vm9, %v1736_v31  ;;  %v2341_v14 = vld [vmem:[%s2762_s28 + $0xd8] sm:$0xff] }
 0x1dd   : > { %v1050_v8 = vpop.permute.xlu1 %1049  ;;  %v1018_v4 = vpop.permute.xlu0 %1017 }
 0x1de   : > { %v1639_v5 = vsel %vm1615_vm5, %v1606_v9, %v1050_v8  ;;  %v1623_v27 = vsel %vm1615_vm5, %v1590_v11, %v1018_v4 }
 0x1df   : > { %1189 = vrot.lane.b32.xlu1 %v2356_v53, %s2684_s7  ;;  %1157 = vrot.lane.b32.xlu0 %v2340_v6, %s2684_s7  ;;  %v2389_v53 = vld [vmem:[%s2762_s28 + $0x199] sm:$0xff] }
 0x1e0   : > { %v2373_v6 = vld [vmem:[%s2762_s28 + $0xd9] sm:$0xff] }
 0x1e1   : > { %v1176_v56 = vpop.permute.xlu1 %1175  ;;  %v1144_v26 = vpop.permute.xlu0 %1143 }
 0x1e2   : > { %v1655_v10 = vsel %vm1648_vm6, %v1622_v60, %v1144_v26  ;;  %v1671_v15 = vsel %vm1648_vm6, %v1638_v33, %v1176_v56 }
 0x1e3   : > { %1315 = vrot.lane.b32.xlu1 %v2387_v32, %s2685_s17  ;;  %1283 = vrot.lane.b32.xlu0 %v2371_v43, %s2685_s17 }
 0x1e5   : > { %v1178_v55 = vpop.permute.xlu1 %1177  ;;  %v1146_v48 = vpop.permute.xlu0 %1145 }
 0x1e6   : > { %v1672_v35 = vsel %vm1648_vm6, %v1639_v5, %v1178_v55  ;;  %v1656_v37 = vsel %vm1648_vm6, %v1623_v27, %v1146_v48  ;;  %v2421_v55 = vld [vmem:[%s2762_s28 + $0x19a] sm:$0xff] }
 0x1e7   : > { %935 = vrot.lane.b32.xlu1 %v2387_v32, %s2682_s5  ;;  %903 = vrot.lane.b32.xlu0 %v2371_v43, %s2682_s5  ;;  %v2390_v32 = vld [vmem:[%s2762_s28 + $0x1a1] sm:$0xff] }
 0x1e8   : > { %v2374_v43 = vld [vmem:[%s2762_s28 + $0xe1] sm:$0xff] }
 0x1e9   : > { %v1304_v59 = vpop.permute.xlu1 %1303  ;;  %v1272_v17 = vpop.permute.xlu0 %1271  ;;  %v2405_v48 = vld [vmem:[%s2762_s28 + $0xda] sm:$0xff] }
 0x1ea   : > { %v1688_v1 = vsel %vm1681_vm7, %v1655_v10, %v1272_v17  ;;  %v1704_v28 = vsel %vm1681_vm7, %v1671_v15, %v1304_v59  ;;  %v1591_v59 = vsel %vm1582_vm4, %v3467_v21, %v3631_v24  ;;  %v1592_v15 = vsel %vm1582_vm4, %v3463_v61, %v3629_v2 }
 0x1eb   : > { %1317 = vrot.lane.b32.xlu1 %v2388_v62, %s2685_s17  ;;  %1285 = vrot.lane.b32.xlu0 %v2372_v12, %s2685_s17 }
 0x1ed   : > { %v1274_v13 = vpop.permute.xlu1 %1273  ;;  %v3943_v45 = vpop.permute.xlu0 %923 }
 0x1ee   : > { %v1689_v19 = vsel %vm1681_vm7, %v1656_v37, %v1274_v13  ;;  %v2406_v13 = vld [vmem:[%s2762_s28 + $0xe2] sm:$0xff] }
 0x1ef   : > { %1443 = vrot.lane.b32.xlu1 %v2419_v50, %s2686_s29  ;;  %1411 = vrot.lane.b32.xlu0 %v2403_v29, %s2686_s29 }
 0x1f1   : > { %v1400_v38 = vpop.permute.xlu1 %1399  ;;  %v1306_v34 = vpop.permute.xlu0 %1305 }
 0x1f2   : > { %v1721_v36 = vsel %vm1714_vm8, %v1688_v1, %v1400_v38  ;;  %v1705_v58 = vsel %vm1681_vm7, %v1672_v35, %v1306_v34  ;;  %v1607_v1 = vsel %vm1582_vm4, %v3555_v0, %v3943_v45 }
 0x1f3   : > { %937 = vrot.lane.b32.xlu1 %v2388_v62, %s2682_s5  ;;  %905 = vrot.lane.b32.xlu0 %v2372_v12, %s2682_s5 }
 0x1f4   : > { %2519 = vmatprep.mubr.msk.f32.mxu0 %vm1759_vm9, %v1721_v36 }
 0x1f5   : > { %v3963_v30 = vpop.permute.xlu1 %925  ;;  %v1432_v25 = vpop.permute.xlu0 %1431 }
 0x1f6   : > { %v1737_v3 = vsel %vm1714_vm8, %v1704_v28, %v1432_v25  ;;  %v1608_v28 = vsel %vm1582_vm4, %v3551_v51, %v3963_v30 }
 0x1f7   : > { %1063 = vrot.lane.b32.xlu1 %v2419_v50, %s2683_s6  ;;  %1031 = vrot.lane.b32.xlu0 %v2403_v29, %s2683_s6  ;;  %v2422_v29 = vld [vmem:[%s2762_s28 + $0x1a2] sm:$0xff]  ;;  %s161_s28 = sand.u32 1, %s2669_s13  }
 0x1f8   : > { %2543 = vmatprep.mubr.msk.f32.mxu1 %vm1759_vm9, %v1737_v3  ;;  %s4232_s16 = scalar_lea.sflag [#allocation3], %s161_s28 }
 0x1f9   : > { %v1052_v40 = vpop.permute.xlu1 %1051  ;;  %v1020_v63 = vpop.permute.xlu0 %1019 }
 0x1fa   : > { %v1624_v17 = vsel %vm1615_vm5, %v1591_v59, %v1020_v63  ;;  %v1640_v24 = vsel %vm1615_vm5, %v1607_v1, %v1052_v40 }
 0x1fb   : > { %1445 = vrot.lane.b32.xlu1 %v2420_v49, %s2686_s29  ;;  %1413 = vrot.lane.b32.xlu0 %v2404_v7, %s2686_s29 }
 0x1fd   : > { %v1434_v47 = vpop.permute.xlu1 %1433  ;;  %v1402_v22 = vpop.permute.xlu0 %1401 }
 0x1fe   : > { %v1738_v20 = vsel %vm1714_vm8, %v1705_v58, %v1434_v47  ;;  %v1722_v44 = vsel %vm1714_vm8, %v1689_v19, %v1402_v22 }
 0x1ff   : > { %1065 = vrot.lane.b32.xlu1 %v2420_v49, %s2683_s6  ;;  %1033 = vrot.lane.b32.xlu0 %v2404_v7, %s2683_s6  ;;  %s2229_s6 = sshll.u32 %s161_s28, 8 }
 0x200   : > { %2520 = vmatmul.mubr.msk.f32.gmra.mxu0 %vm1759_vm9, %v1722_v44  ;;  %2544 = vmatmul.mubr.msk.f32.gmra.mxu1 %vm1759_vm9, %v1738_v20  ;;  %v1593_v20 = vsel %vm1582_vm4, %v3479_v16, %v3638_v23 }
 0x201   : > { %v1054_v39 = vpop.permute.xlu1 %1053  ;;  %v1022_v57 = vpop.permute.xlu0 %1021 }
 0x202   : > { %v1641_v25 = vsel %vm1615_vm5, %v1608_v28, %v1054_v39  ;;  %v1625_v3 = vsel %vm1615_vm5, %v1592_v15, %v1022_v57 }
 0x203   : > { %1191 = vrot.lane.b32.xlu1 %v2357_v42, %s2684_s7  ;;  %1159 = vrot.lane.b32.xlu0 %v2341_v14, %s2684_s7 }
 0x205   : > { %v1180_v31 = vpop.permute.xlu1 %1179  ;;  %v1148_v18 = vpop.permute.xlu0 %1147 }
 0x206   : > { %v1657_v50 = vsel %vm1648_vm6, %v1624_v17, %v1148_v18  ;;  %v1673_v38 = vsel %vm1648_vm6, %v1640_v24, %v1180_v31 }
 0x207   : > { %1193 = vrot.lane.b32.xlu1 %v2358_v54, %s2684_s7  ;;  %1161 = vrot.lane.b32.xlu0 %v2342_v41, %s2684_s7  ;;  %v4418_v54 = vld [vmem:[#allocation39_spill] sm:$0xff]  ;;  %s4093_s7 = scalar_lea.vmem [#allocation2], %s2229_s6 }
 0x208   : > { %s2163_s9 = sshll.u32 %s4093_s7, 4  ;;  %s4226_s9 = int_to_ptr.vmem [resolvable:$true] %s2163_s9 }
 0x209   : > { %v1182_v8 = vpop.permute.xlu1 %1181  ;;  %v1150_v4 = vpop.permute.xlu0 %1149  ;;  %s2617_s19 = scalar_lea.vmem %s4226_s9, 4096  ;;  %p2624_p0 = scmp.lt.s32.totalorder %s4226_s9, %s2622_s24 }
 0x20a   : > { %v1674_v49 = vsel %vm1648_vm6, %v1641_v25, %v1182_v8  ;;  %v1658_v7 = vsel %vm1648_vm6, %v1625_v3, %v1150_v4  ;;  %p2618_p11 = scmp.ne.s32.totalorder %s4226_s9, %s2617_s19  ;;  %p2625_p1 = scmp.lt.s32.totalorder %s2623_s25, %s2617_s19 }
 0x20b   : > { %1319 = vrot.lane.b32.xlu1 %v2389_v53, %s2685_s17  ;;  %1287 = vrot.lane.b32.xlu0 %v2373_v6, %s2685_s17 }
 0x20c   : > { %p2619_p12 = pnand %p2618_p11, %p2747_p5  ;;  %p2626_p2 = por %p2625_p1, %p2624_p0 }
 0x20d   : > { %v1308_v56 = vpop.permute.xlu1 %1307  ;;  %v1276_v26 = vpop.permute.xlu0 %1275 }
 0x20e   : > { %v1690_v52 = vsel %vm1681_vm7, %v1657_v50, %v1276_v26  ;;  %v1706_v34 = vsel %vm1681_vm7, %v1673_v38, %v1308_v56  ;;  %v4420_v56 = vld [vmem:[#allocation35_spill] sm:$0xff]  ;;  %p2620_p13 = pneg %p2619_p12 }
 0x20f   : > { %1321 = vrot.lane.b32.xlu1 %v2390_v32, %s2685_s17  ;;  %1289 = vrot.lane.b32.xlu0 %v2374_v43, %s2685_s17  ;;  %v4419_v43 = vld [vmem:[#allocation16_spill] sm:$0xff]  ;;  %s4222_s17 = scalar_lea.hbm %s4276_s3, %s2462_s8 }
 0x210   : > { %v1594_v26 = vsel %vm1582_vm4, %v4420_v56, %v4419_v43  ;;  %p2627_p3 = pnand %p2626_p2, %p2620_p13 }
 0x211   : > { %v1278_v62 = vpop.permute.xlu1 %1277  ;;  %v928_v12 = vpop.permute.xlu0 %927 }
 0x212   : > { %v1691_v40 = vsel %vm1681_vm7, %v1658_v7, %v1278_v62  ;;  %v1609_v41 = vsel %vm1582_vm4, %v4418_v54, %v928_v12 }
 0x213   : > { %1447 = vrot.lane.b32.xlu1 %v2421_v55, %s2686_s29  ;;  %1415 = vrot.lane.b32.xlu0 %v2405_v48, %s2686_s29  ;;  %v4421_v55 = vld [vmem:[#allocation44_spill] sm:$0xff] }
 0x215   : > { %v1404_v60 = vpop.permute.xlu1 %1403  ;;  %v1310_v10 = vpop.permute.xlu0 %1309 }
 0x216   : > { %v1723_v21 = vsel %vm1714_vm8, %v1690_v52, %v1404_v60  ;;  %v1707_v63 = vsel %vm1681_vm7, %v1674_v49, %v1310_v10 }
 0x217   : > { %1449 = vrot.lane.b32.xlu1 %v2422_v29, %s2686_s29  ;;  %1417 = vrot.lane.b32.xlu0 %v2406_v13, %s2686_s29 }
 0x218   : > { %2522 = vmatprep.mubr.msk.f32.mxu0 %vm1759_vm9, %v1723_v21 }
 0x219   : > { %v930_v46 = vpop.permute.xlu1 %929  ;;  %v1436_v36 = vpop.permute.xlu0 %1435 }
 0x21a   : > { %v1739_v33 = vsel %vm1714_vm8, %v1706_v34, %v1436_v36  ;;  %v1610_v48 = vsel %vm1582_vm4, %v4421_v55, %v930_v46  ;;  %v4085_v36 = vld [vmem:[%s4275_s2] ss:$0 sm:$0xff] }
 0x21b   : > { %2546 = vmatprep.mubr.msk.f32.mxu1 %vm1759_vm9, %v1739_v33 }
 0x21d   : > { %v1056_v0 = vpop.permute.xlu1 %1055  ;;  %v1024_v45 = vpop.permute.xlu0 %1023 }
 0x21e   : > { %v1626_v44 = vsel %vm1615_vm5, %v1593_v20, %v1024_v45  ;;  %v1642_v18 = vsel %vm1615_vm5, %v1609_v41, %v1056_v0 }
 0x221   : > { %v1438_v11 = vpop.permute.xlu1 %1437  ;;  %v1406_v9 = vpop.permute.xlu0 %1405 }
 0x222   : > { %v1740_v61 = vsel %vm1714_vm8, %v1707_v63, %v1438_v11  ;;  %v1724_v2 = vsel %vm1714_vm8, %v1691_v40, %v1406_v9 }
 0x223   : > { %2523 = vmatmul.mubr.msk.f32.gmra.mxu0 %vm1759_vm9, %v1724_v2  ;;  %2547 = vmatmul.mubr.msk.f32.gmra.mxu1 %vm1759_vm9, %v1740_v61 }
 0x225   : > { %v1058_v51 = vpop.permute.xlu1 %1057  ;;  %v1026_v30 = vpop.permute.xlu0 %1025 }
 0x226   : > { %v1643_v62 = vsel %vm1615_vm5, %v1610_v48, %v1058_v51  ;;  %v1627_v12 = vsel %vm1615_vm5, %v1594_v26, %v1026_v30 }
 0x229   : > { %v1184_v5 = vpop.permute.xlu1 %1183  ;;  %v1152_v27 = vpop.permute.xlu0 %1151 }
 0x22a   : > { %v1659_v42 = vsel %vm1648_vm6, %v1626_v44, %v1152_v27  ;;  %v1675_v53 = vsel %vm1648_vm6, %v1642_v18, %v1184_v5  ;;  %v4422_v27 = vld [vmem:[#allocation10_spill] sm:$0xff] }
 0x22d   : > { %v1186_v35 = vpop.permute.xlu1 %1185  ;;  %v1154_v37 = vpop.permute.xlu0 %1153 }
 0x22e   : > { %v1676_v59 = vsel %vm1648_vm6, %v1643_v62, %v1186_v35  ;;  %v1660_v17 = vsel %vm1648_vm6, %v1627_v12, %v1154_v37  ;;  %v4423_v35 = vld [vmem:[#allocation37_spill] sm:$0xff] }
 0x22f   : > { %v1595_v37 = vsel %vm1582_vm4, %v4423_v35, %v4422_v27 }
 0x231   : > { %v1312_v19 = vpop.permute.xlu1 %1311  ;;  %v1280_v58 = vpop.permute.xlu0 %1279 }
 0x232   : > { %v1692_v14 = vsel %vm1681_vm7, %v1659_v42, %v1280_v58  ;;  %v1708_v16 = vsel %vm1681_vm7, %v1675_v53, %v1312_v19  ;;  %v4424_v19 = vld [vmem:[#allocation6_spill] sm:$0xff] }
 0x235   : > { %v1282_v47 = vpop.permute.xlu1 %1281  ;;  %v4047_v22 = vpop.permute.xlu0 %931 }
 0x236   : > { %v1693_v50 = vsel %vm1681_vm7, %v1660_v17, %v1282_v47  ;;  %v1611_v58 = vsel %vm1582_vm4, %v4424_v19, %v4047_v22 }
 0x239   : > { %v1408_v39 = vpop.permute.xlu1 %1407  ;;  %v1314_v57 = vpop.permute.xlu0 %1313 }
 0x23a   : > { %v1725_v31 = vsel %vm1714_vm8, %v1692_v14, %v1408_v39  ;;  %v1709_v29 = vsel %vm1681_vm7, %v1676_v59, %v1314_v57 }
 0x23b   : > { %2525 = vmatprep.mubr.msk.f32.mxu0 %vm1759_vm9, %v1725_v31 }
 0x23d   : > { %v4062_v23 = vpop.permute.xlu1 %933  ;;  %v1440_v6 = vpop.permute.xlu0 %1439 }
 0x23e   : > { %v1741_v8 = vsel %vm1714_vm8, %v1708_v16, %v1440_v6  ;;  %v4425_v6 = vld [vmem:[#allocation15_spill] sm:$0xff] }
 0x23f   : > { %2549 = vmatprep.mubr.msk.f32.mxu1 %vm1759_vm9, %v1741_v8  ;;  %v4426_v8 = vld [vmem:[#allocation36_spill] sm:$0xff] }
 0x241   : > { %v1060_v4 = vpop.permute.xlu1 %1059  ;;  %v1028_v32 = vpop.permute.xlu0 %1027 }
 0x242   : > { %v1644_v47 = vsel %vm1615_vm5, %v1611_v58, %v1060_v4  ;;  %v1628_v20 = vsel %vm1615_vm5, %v1595_v37, %v1028_v32  ;;  %v1596_v4 = vsel %vm1582_vm4, %v4426_v8, %v4425_v6  ;;  %v4427_v32 = vld [vmem:[#allocation40_spill] sm:$0xff] }
 0x243   : > { %v1612_v43 = vsel %vm1582_vm4, %v4427_v32, %v4062_v23 }
 0x245   : > { %v1442_v13 = vpop.permute.xlu1 %1441  ;;  %v1410_v52 = vpop.permute.xlu0 %1409 }
 0x246   : > { %v1742_v60 = vsel %vm1714_vm8, %v1709_v29, %v1442_v13  ;;  %v1726_v10 = vsel %vm1714_vm8, %v1693_v50, %v1410_v52 }
 0x247   : > { %2526 = vmatmul.mubr.msk.f32.gmra.mxu0 %vm1759_vm9, %v1726_v10  ;;  %2550 = vmatmul.mubr.msk.f32.gmra.mxu1 %vm1759_vm9, %v1742_v60 }
 0x249   : > { %v1062_v1 = vpop.permute.xlu1 %1061  ;;  %v1030_v21 = vpop.permute.xlu0 %1029 }
 0x24a   : > { %v1645_v56 = vsel %vm1615_vm5, %v1612_v43, %v1062_v1  ;;  %v1629_v26 = vsel %vm1615_vm5, %v1596_v4, %v1030_v21 }
 0x24d   : > { %v1188_v24 = vpop.permute.xlu1 %1187  ;;  %v1156_v38 = vpop.permute.xlu0 %1155 }
 0x24e   : > { %v1677_v44 = vsel %vm1648_vm6, %v1644_v47, %v1188_v24  ;;  %v1661_v42 = vsel %vm1648_vm6, %v1628_v20, %v1156_v38 }
 0x251   : > { %v1190_v34 = vpop.permute.xlu1 %1189  ;;  %v1158_v46 = vpop.permute.xlu0 %1157 }
 0x252   : > { %v1678_v55 = vsel %vm1648_vm6, %v1645_v56, %v1190_v34  ;;  %v1662_v48 = vsel %vm1648_vm6, %v1629_v26, %v1158_v46 }
 0x254   : > { %v2512_v33 = vpop.f32.mrf.mxu0  ;;  %v2536_v0 = vpop.f32.mrf.mxu1 }
 0x255   : > { %v1932_v45 = vadd.f32 %v2512_v33, %v4085_v36  ;;  %v2012_v15 = vadd.f32 %v2536_v0, %v4085_v36  ;;  %v1316_v28 = vpop.permute.xlu1 %1315  ;;  %v1284_v25 = vpop.permute.xlu0 %1283 }
 0x256   : > { %v1926_v3 = vpop.f32.mrf.mxu0  ;;  %v2006_v49 = vpop.f32.mrf.mxu1  ;;  %v1710_v14 = vsel %vm1681_vm7, %v1677_v44, %v1316_v28  ;;  %v1694_v39 = vsel %vm1681_vm7, %v1661_v42, %v1284_v25  ;;  %v4430_v44 = vld [vmem:[#allocation11_spill] sm:$0xff] }
 0x257   : > { %v2086_v7 = vmax.f32 %v1932_v45, 0.0  ;;  %v2102_v40 = vmax.f32 %v2012_v15, 0.0  ;;  %v1927_v63 = vadd.f32 %v4085_v36, %v1926_v3  ;;  %v2007_v11 = vadd.f32 %v4085_v36, %v2006_v49  ;;  %v4431_v42 = vld [vmem:[#allocation43_spill] sm:$0xff] }
 0x259   : > { %2118 = vst [vmem:[%s4093_s7 + $0x8] sm:$0xff] %v2086_v7  ;;  %2134 = vst [vmem:[%s4093_s7 + $0x88] sm:$0xff] %v2102_v40  ;;  %v2085_v9 = vmax.f32 %v1927_v63, 0.0  ;;  %v2101_v61 = vmax.f32 %v2007_v11, 0.0  ;;  %v4097_v2 = vpop.permute.xlu1 %935  ;;  %v4099_v51 = vpop.permute.xlu0 %903  ;;  %v4428_v11 = vld [vmem:[#allocation5_spill] sm:$0xff] }
 0x25b   : > { %2117 = vst [vmem:[%s4093_s7] sm:$0xff] %v2085_v9  ;;  %2133 = vst [vmem:[%s4093_s7 + $0x80] sm:$0xff] %v2101_v61  ;;  %v1613_v9 = vsel %vm1582_vm4, %v4428_v11, %v4097_v2  ;;  %v4429_v61 = vld [vmem:[#allocation38_spill] sm:$0xff] }
 0x25d   : > { %v1318_v30 = vpop.permute.xlu1 %1317  ;;  %v1286_v5 = vpop.permute.xlu0 %1285 }
 0x25e   : > { %v1711_v62 = vsel %vm1681_vm7, %v1678_v55, %v1318_v30  ;;  %v1695_v12 = vsel %vm1681_vm7, %v1662_v48, %v1286_v5  ;;  %v1597_v30 = vsel %vm1582_vm4, %v4429_v61, %v4099_v51 }
 0x261   : > { %v1444_v57 = vpop.permute.xlu1 %1443  ;;  %v1412_v54 = vpop.permute.xlu0 %1411 }
 0x262   : > { %v1743_v41 = vsel %vm1714_vm8, %v1710_v14, %v1444_v57  ;;  %v1727_v31 = vsel %vm1714_vm8, %v1694_v39, %v1412_v54 }
 0x263   : > { %2528 = vmatprep.mubr.msk.f32.mxu0 %vm1759_vm9, %v1727_v31  ;;  %2552 = vmatprep.mubr.msk.f32.mxu1 %vm1759_vm9, %v1743_v41 }
 0x265   : > { %v938_v22 = vpop.permute.xlu1 %937  ;;  %v906_v18 = vpop.permute.xlu0 %905 }
 0x266   : > { %v1614_v2 = vsel %vm1582_vm4, %v4430_v44, %v938_v22  ;;  %v1598_v51 = vsel %vm1582_vm4, %v4431_v42, %v906_v18 }
 0x269   : > { %v1064_v53 = vpop.permute.xlu1 %1063  ;;  %v1032_v16 = vpop.permute.xlu0 %1031 }
 0x26a   : > { %v1646_v5 = vsel %vm1615_vm5, %v1613_v9, %v1064_v53  ;;  %v1630_v27 = vsel %vm1615_vm5, %v1597_v30, %v1032_v16 }
 0x26d   : > { %v1446_v59 = vpop.permute.xlu1 %1445  ;;  %v1414_v17 = vpop.permute.xlu0 %1413 }
 0x26e   : > { %v1744_v50 = vsel %vm1714_vm8, %v1711_v62, %v1446_v59  ;;  %v1728_v29 = vsel %vm1714_vm8, %v1695_v12, %v1414_v17 }
 0x26f   : > { %2529 = vmatmul.mubr.msk.f32.gmra.mxu0 %vm1759_vm9, %v1728_v29  ;;  %2553 = vmatmul.mubr.msk.f32.gmra.mxu1 %vm1759_vm9, %v1744_v50 }
 0x271   : > { %v1066_v23 = vpop.permute.xlu1 %1065  ;;  %v1034_v13 = vpop.permute.xlu0 %1033 }
 0x272   : > { %v1647_v57 = vsel %vm1615_vm5, %v1614_v2, %v1066_v23  ;;  %v1631_v54 = vsel %vm1615_vm5, %v1598_v51, %v1034_v13 }
 0x275   : > { %v1192_v52 = vpop.permute.xlu1 %1191  ;;  %v1160_v60 = vpop.permute.xlu0 %1159 }
 0x276   : > { %v1679_v35 = vsel %vm1648_vm6, %v1646_v5, %v1192_v52  ;;  %v1663_v37 = vsel %vm1648_vm6, %v1630_v27, %v1160_v60 }
 0x278   : > { %v2515_v10 = vpop.f32.mrf.mxu0  ;;  %v2539_v1 = vpop.f32.mrf.mxu1 }
 0x279   : > { %v1942_v21 = vadd.f32 %v2515_v10, %v4085_v36  ;;  %v2022_v24 = vadd.f32 %v2539_v1, %v4085_v36  ;;  %v1194_v38 = vpop.permute.xlu1 %1193  ;;  %v1162_v34 = vpop.permute.xlu0 %1161 }
 0x27a   : > { %v1936_v46 = vpop.f32.mrf.mxu0  ;;  %v2016_v33 = vpop.f32.mrf.mxu1  ;;  %v1680_v41 = vsel %vm1648_vm6, %v1647_v57, %v1194_v38  ;;  %v1664_v31 = vsel %vm1648_vm6, %v1631_v54, %v1162_v34 }
 0x27b   : > { %v2088_v0 = vmax.f32 %v1942_v21, 0.0  ;;  %v2104_v45 = vmax.f32 %v2022_v24, 0.0  ;;  %v1937_v15 = vadd.f32 %v4085_v36, %v1936_v46  ;;  %v2017_v28 = vadd.f32 %v4085_v36, %v2016_v33 }
 0x27d   : > { %2120 = vst [vmem:[%s4093_s7 + $0x18] sm:$0xff] %v2088_v0  ;;  %2136 = vst [vmem:[%s4093_s7 + $0x98] sm:$0xff] %v2104_v45  ;;  %v2087_v25 = vmax.f32 %v1937_v15, 0.0  ;;  %v2103_v3 = vmax.f32 %v2017_v28, 0.0  ;;  %v1320_v49 = vpop.permute.xlu1 %1319  ;;  %v1288_v7 = vpop.permute.xlu0 %1287 }
 0x27e   : > { %v1712_v19 = vsel %vm1681_vm7, %v1679_v35, %v1320_v49  ;;  %v1696_v58 = vsel %vm1681_vm7, %v1663_v37, %v1288_v7 }
 0x27f   : > { %2119 = vst [vmem:[%s4093_s7 + $0x10] sm:$0xff] %v2087_v25  ;;  %2135 = vst [vmem:[%s4093_s7 + $0x90] sm:$0xff] %v2103_v3 }
 0x281   : > { %v1322_v40 = vpop.permute.xlu1 %1321  ;;  %v1290_v63 = vpop.permute.xlu0 %1289 }
 0x282   : > { %v1713_v22 = vsel %vm1681_vm7, %v1680_v41, %v1322_v40  ;;  %v1697_v18 = vsel %vm1681_vm7, %v1664_v31, %v1290_v63 }
 0x285   : > { %v1448_v47 = vpop.permute.xlu1 %1447  ;;  %v1416_v20 = vpop.permute.xlu0 %1415 }
 0x286   : > { %v1745_v14 = vsel %vm1714_vm8, %v1712_v19, %v1448_v47  ;;  %v1729_v39 = vsel %vm1714_vm8, %v1696_v58, %v1416_v20 }
 0x287   : > { %2531 = vmatprep.mubr.msk.f32.mxu0 %vm1759_vm9, %v1729_v39  ;;  %2555 = vmatprep.mubr.msk.f32.mxu1 %vm1759_vm9, %v1745_v14 }
 0x289   : > { %v1450_v53 = vpop.permute.xlu1 %1449  ;;  %v1418_v16 = vpop.permute.xlu0 %1417 }
 0x28a   : > { %v1746_v6 = vsel %vm1714_vm8, %v1713_v22, %v1450_v53  ;;  %v1730_v8 = vsel %vm1714_vm8, %v1697_v18, %v1418_v16 }
 0x28b   : > { %2532 = vmatmul.mubr.msk.f32.gmra.mxu0 %vm1759_vm9, %v1730_v8  ;;  %2556 = vmatmul.mubr.msk.f32.gmra.mxu1 %vm1759_vm9, %v1746_v6 }
 0x29c   : > { %v2518_v4 = vpop.f32.mrf.mxu0  ;;  %v2542_v32 = vpop.f32.mrf.mxu1 }
 0x29d   : > { %v1952_v43 = vadd.f32 %v2518_v4, %v4085_v36  ;;  %v2032_v56 = vadd.f32 %v2542_v32, %v4085_v36 }
 0x29e   : > { %v1946_v26 = vpop.f32.mrf.mxu0  ;;  %v2026_v55 = vpop.f32.mrf.mxu1 }
 0x29f   : > { %v2090_v48 = vmax.f32 %v1952_v43, 0.0  ;;  %v2106_v62 = vmax.f32 %v2032_v56, 0.0  ;;  %v1947_v12 = vadd.f32 %v4085_v36, %v1946_v26  ;;  %v2027_v59 = vadd.f32 %v4085_v36, %v2026_v55 }
 0x2a1   : > { %2122 = vst [vmem:[%s4093_s7 + $0x28] sm:$0xff] %v2090_v48  ;;  %2138 = vst [vmem:[%s4093_s7 + $0xa8] sm:$0xff] %v2106_v62  ;;  %v2089_v17 = vmax.f32 %v1947_v12, 0.0  ;;  %v2105_v50 = vmax.f32 %v2027_v59, 0.0 }
 0x2a3   : > { %2121 = vst [vmem:[%s4093_s7 + $0x20] sm:$0xff] %v2089_v17  ;;  %2137 = vst [vmem:[%s4093_s7 + $0xa0] sm:$0xff] %v2105_v50 }
 0x2c0   : > { %v2521_v29 = vpop.f32.mrf.mxu0  ;;  %v2545_v23 = vpop.f32.mrf.mxu1 }
 0x2c1   : > { %v1962_v13 = vadd.f32 %v2521_v29, %v4085_v36  ;;  %v2042_v52 = vadd.f32 %v2545_v23, %v4085_v36 }
 0x2c2   : > { %v1956_v60 = vpop.f32.mrf.mxu0  ;;  %v2036_v10 = vpop.f32.mrf.mxu1 }
 0x2c3   : > { %v2092_v1 = vmax.f32 %v1962_v13, 0.0  ;;  %v2108_v21 = vmax.f32 %v2042_v52, 0.0  ;;  %v1957_v24 = vadd.f32 %v4085_v36, %v1956_v60  ;;  %v2037_v38 = vadd.f32 %v4085_v36, %v2036_v10 }
 0x2c5   : > { %2124 = vst [vmem:[%s4093_s7 + $0x38] sm:$0xff] %v2092_v1  ;;  %2140 = vst [vmem:[%s4093_s7 + $0xb8] sm:$0xff] %v2108_v21  ;;  %v2091_v34 = vmax.f32 %v1957_v24, 0.0  ;;  %v2107_v46 = vmax.f32 %v2037_v38, 0.0 }
 0x2c7   : > { %2123 = vst [vmem:[%s4093_s7 + $0x30] sm:$0xff] %v2091_v34  ;;  %2139 = vst [vmem:[%s4093_s7 + $0xb0] sm:$0xff] %v2107_v46 }
 0x2e3   : > { %v2524_v33 = vpop.f32.mrf.mxu0  ;;  %v2548_v0 = vpop.f32.mrf.mxu1 }
 0x2e4   : > { %v1972_v45 = vadd.f32 %v2524_v33, %v4085_v36  ;;  %v2052_v15 = vadd.f32 %v2548_v0, %v4085_v36 }
 0x2e5   : > { %v1966_v28 = vpop.f32.mrf.mxu0  ;;  %v2046_v25 = vpop.f32.mrf.mxu1 }
 0x2e6   : > { %v2094_v3 = vmax.f32 %v1972_v45, 0.0  ;;  %v2110_v49 = vmax.f32 %v2052_v15, 0.0  ;;  %v1967_v7 = vadd.f32 %v4085_v36, %v1966_v28  ;;  %v2047_v40 = vadd.f32 %v4085_v36, %v2046_v25 }
 0x2e8   : > { %2126 = vst [vmem:[%s4093_s7 + $0x48] sm:$0xff] %v2094_v3  ;;  %2142 = vst [vmem:[%s4093_s7 + $0xc8] sm:$0xff] %v2110_v49  ;;  %v2093_v63 = vmax.f32 %v1967_v7, 0.0  ;;  %v2109_v11 = vmax.f32 %v2047_v40, 0.0 }
 0x2ea   : > { %2125 = vst [vmem:[%s4093_s7 + $0x40] sm:$0xff] %v2093_v63  ;;  %2141 = vst [vmem:[%s4093_s7 + $0xc0] sm:$0xff] %v2109_v11 }
 0x307   : > { %v2527_v9 = vpop.f32.mrf.mxu0  ;;  %v2551_v61 = vpop.f32.mrf.mxu1 }
 0x308   : > { %v1982_v30 = vadd.f32 %v2527_v9, %v4085_v36  ;;  %v2062_v5 = vadd.f32 %v2551_v61, %v4085_v36 }
 0x309   : > { %v1976_v27 = vpop.f32.mrf.mxu0  ;;  %v2056_v35 = vpop.f32.mrf.mxu1 }
 0x30a   : > { %v2096_v37 = vmax.f32 %v1982_v30, 0.0  ;;  %v2112_v19 = vmax.f32 %v2062_v5, 0.0  ;;  %v1977_v58 = vadd.f32 %v4085_v36, %v1976_v27  ;;  %v2057_v47 = vadd.f32 %v4085_v36, %v2056_v35 }
 0x30c   : > { %2128 = vst [vmem:[%s4093_s7 + $0x58] sm:$0xff] %v2096_v37  ;;  %2144 = vst [vmem:[%s4093_s7 + $0xd8] sm:$0xff] %v2112_v19  ;;  %v2095_v20 = vmax.f32 %v1977_v58, 0.0  ;;  %v2111_v44 = vmax.f32 %v2057_v47, 0.0 }
 0x30e   : > { %2127 = vst [vmem:[%s4093_s7 + $0x50] sm:$0xff] %v2095_v20  ;;  %2143 = vst [vmem:[%s4093_s7 + $0xd0] sm:$0xff] %v2111_v44 }
 0x32f   : > { %v2530_v2 = vpop.f32.mrf.mxu0  ;;  %v2554_v42 = vpop.f32.mrf.mxu1 }
 0x330   : > { %v1992_v51 = vadd.f32 %v2530_v2, %v4085_v36  ;;  %v2072_v14 = vadd.f32 %v2554_v42, %v4085_v36 }
 0x331   : > { %v1986_v39 = vpop.f32.mrf.mxu0  ;;  %v2066_v57 = vpop.f32.mrf.mxu1 }
 0x332   : > { %v2098_v54 = vmax.f32 %v1992_v51, 0.0  ;;  %v2114_v41 = vmax.f32 %v2072_v14, 0.0  ;;  %v1987_v31 = vadd.f32 %v4085_v36, %v1986_v39  ;;  %v2067_v22 = vadd.f32 %v4085_v36, %v2066_v57 }
 0x334   : > { %2130 = vst [vmem:[%s4093_s7 + $0x68] sm:$0xff] %v2098_v54  ;;  %2146 = vst [vmem:[%s4093_s7 + $0xe8] sm:$0xff] %v2114_v41  ;;  %v2097_v18 = vmax.f32 %v1987_v31, 0.0  ;;  %v2113_v53 = vmax.f32 %v2067_v22, 0.0 }
 0x336   : > { %2129 = vst [vmem:[%s4093_s7 + $0x60] sm:$0xff] %v2097_v18  ;;  %2145 = vst [vmem:[%s4093_s7 + $0xe0] sm:$0xff] %v2113_v53 }
 0x34b   : > { %v2533_v16 = vpop.f32.mrf.mxu0  ;;  %v2557_v6 = vpop.f32.mrf.mxu1 }
 0x34c   : > { %v2002_v8 = vadd.f32 %v2533_v16, %v4085_v36  ;;  %v2082_v4 = vadd.f32 %v2557_v6, %v4085_v36 }
 0x34d   : > { %v1996_v32 = vpop.f32.mrf.mxu0  ;;  %v2076_v43 = vpop.f32.mrf.mxu1 }
 0x34e   : > { %v2100_v56 = vmax.f32 %v2002_v8, 0.0  ;;  %v2116_v26 = vmax.f32 %v2082_v4, 0.0  ;;  %v1997_v55 = vadd.f32 %v4085_v36, %v1996_v32  ;;  %v2077_v48 = vadd.f32 %v4085_v36, %v2076_v43 }
 0x350   : > { %2132 = vst [vmem:[%s4093_s7 + $0x78] sm:$0xff] %v2100_v56  ;;  %2148 = vst [vmem:[%s4093_s7 + $0xf8] sm:$0xff] %v2116_v26  ;;  %v2099_v62 = vmax.f32 %v1997_v55, 0.0  ;;  %v2115_v12 = vmax.f32 %v2077_v48, 0.0 }
 0x352   : > { %2131 = vst [vmem:[%s4093_s7 + $0x70] sm:$0xff] %v2099_v62  ;;  %2147 = vst [vmem:[%s4093_s7 + $0xf0] sm:$0xff] %v2115_v12 }
 0x353   : > { %2630 = shalt.err (!%p2627_p3)
}
 0x354   : > { %s2631_s26 = scalar_lea.hbm %s4222_s17, 4096  ;;  %s2635_s28 = scalar_lea.hbm %s4276_s3, 8192 }
 0x355   : > { %p2632_p4 = scmp.ne.s32.totalorder %s4222_s17, %s2631_s26  ;;  %p2636_p9 = scmp.lt.s32.totalorder %s4222_s17, %s4276_s3 }
 0x356   : > { %p2637_p10 = scmp.lt.s32.totalorder %s2635_s28, %s2631_s26 }
 0x357   : > { %p2633_p7 = pnand %p2632_p4, %p2747_p5 }
 0x358   : > { %p2638_p11 = por %p2637_p10, %p2636_p9 }
 0x359   : > { %p2634_p8 = pneg %p2633_p7 }
 0x35b   : > { %p2639_p12 = pnand %p2638_p11, %p2634_p8 }
 0x35d   : > { %2642 = shalt.err (!%p2639_p12)
}
 0x35e   : > { %s2688_s6 = smov 128  }
 0x35f   : > { %2569 = dma.vmem_to_hbm [thread:$0]  (%p2747_p5), %s4226_s9, 4096, %s4222_s17, %s4232_s16, %s2688_s6, %s2688_s6, %s2680_s30  }
 0x360 PF: > { %p2575_p13 = scmp.ge.s32.totalorder %s2677_s15, 2  ;;  %s2178_s7 = sand.u32 1, %s2665_s12  }
 0x361   : > { %s2179_s8 = scalar_lea.sflag [#allocation3], %s2178_s7 }
 0x362   : > { %p2572_p0 = pnand %p2575_p13, %p2751_p6 }
 0x364   : > { %p2573_p1 = pneg %p2572_p0 }
 0x366   : > { %2660 = dma.done.wait (%p2573_p1), %s2179_s8, 4096  }
 0x367   : > { %2662 = vsyncadd (%p2573_p1), %s2179_s8, 4294963200  ;;  %p13_p2 = scmp.ge.s32.totalorder %s2734_s18, 4   ;;  %s4432_s12 = smov %s2669_s13 }
 0x368   : > { %s4433_s13 = smov %s2673_s14  ;;  %s4434_s14 = smov %s2745_s21 }
 0x369   : > { %s4435_s15 = smov %s2734_s18  ;;  %15 = sbr.rel (!%p13_p2) target bundleno = 3 (0x3), region = 69 }
 0x36e   :  { %2184 = vsyncpa [#allocation3], 1 }
 0x36f   :  { %2186 = vsyncpa [#allocation3 + $0x1], 1 }

</bundles_post_ra>
